<compile_context>
chip_gen: v5e
topology: v5e:2x2
jax: 0.10.0
libtpu: 0.0.40
codegen_flags: <defaults>
</compile_context>

<pallas_src>
import functools
import math

import jax
import jax.numpy as jnp
import numpy as np
from jax.experimental import pallas as pl
from jax.experimental.pallas import tpu as pltpu


def _layernorm_f32(t, g, b, eps=1e-6):
    # LayerNorm subclass in the reference always computes in float32, eps=1e-6.
    mu = jnp.mean(t, axis=-1, keepdims=True)
    var = jnp.mean(jnp.square(t - mu), axis=-1, keepdims=True)
    return (t - mu) * jax.lax.rsqrt(var + eps) * g + b


def transformer_stack_kernel(x_ref, ln1g_ref, ln1b_ref, wq_ref, bq_ref,
                             wk_ref, bk_ref, wv_ref, bv_ref, wo_ref, bo_ref,
                             ln2g_ref, ln2b_ref, wfc_ref, bfc_ref,
                             wpr_ref, bpr_ref, o_ref, x_acc, attn_scr,
                             *, seq_len, batch, heads, mlp_rows, mlp_chunks):
    """Grid = (batch_tiles, layers). One inner step == one ResidualAttentionBlock
    applied to this batch tile; residual state carried in x_acc (f32 VMEM)."""
    layer = pl.program_id(1)
    last_layer = pl.num_programs(1) - 1

    @pl.when(layer == 0)
    def _():
        x_acc[...] = x_ref[...].astype(jnp.float32)

    L, N, H = seq_len, batch, heads
    T, E = x_ref.shape          # T = N * L (batch-major token slab for this tile)
    Dh = E // H
    cdt = wq_ref.dtype          # MXU compute dtype (f32 here; bf16 for prod widths)

    x = x_acc[...]              # (T, E) f32

    # ---------------- x + out_proj(MHA(ln_1(x))) ----------------
    h1 = _layernorm_f32(x, ln1g_ref[0], ln1b_ref[0]).astype(cdt)
    # 1/sqrt(Dh) is pre-folded into wq/bq on the host.
    q = jnp.dot(h1, wq_ref[0], preferred_element_type=jnp.float32) + bq_ref[0]
    k = jnp.dot(h1, wk_ref[0], preferred_element_type=jnp.float32) + bk_ref[0]
    v = jnp.dot(h1, wv_ref[0], preferred_element_type=jnp.float32) + bv_ref[0]

    # Static loop over heads; each head's context is written straight into the
    # f32 attention scratch (static lane slice), so the (N, L, L) score tile is
    # dead right after the store and no H-way concatenate is needed.
    for h in range(H):
        sl = slice(h * Dh, (h + 1) * Dh)
        qh = q[:, sl].reshape(N, L, Dh).astype(cdt)
        kh = k[:, sl].reshape(N, L, Dh).astype(cdt)
        vh = v[:, sl].reshape(N, L, Dh).astype(cdt)
        s = jnp.einsum("nld,nmd->nlm", qh, kh,
                       preferred_element_type=jnp.float32)      # (N, L, L)
        s = s - jnp.max(s, axis=-1, keepdims=True)
        p = jnp.exp(s)
        p = p * pl.reciprocal(jnp.sum(p, axis=-1, keepdims=True), approx=True)
        ctx = jnp.einsum("nlm,nmd->nld", p.astype(cdt), vh,
                         preferred_element_type=jnp.float32)     # (N, L, Dh)
        attn_scr[:, sl] = ctx.reshape(T, Dh)                     # head-major features

    attn_out = jnp.dot(attn_scr[...].astype(cdt), wo_ref[0],
                       preferred_element_type=jnp.float32) + bo_ref[0]
    x1 = x + attn_out
    x_acc[...] = x1

    # ---------------- x + mlp(ln_2(x)), row-chunked ----------------
    ln2g, ln2b = ln2g_ref[0], ln2b_ref[0]
    wfc, bfc = wfc_ref[0], bfc_ref[0]
    wpr, bpr = wpr_ref[0], bpr_ref[0]
    c = math.sqrt(2.0 / math.pi)

    def mlp_block(xc):
        h2 = _layernorm_f32(xc, ln2g, ln2b).astype(cdt)
        fc = jnp.dot(h2, wfc, preferred_element_type=jnp.float32) + bfc
        g = 0.5 * fc * (1.0 + jnp.tanh(c * (fc + 0.044715 * fc * fc * fc)))  # tanh-GELU
        return xc + jnp.dot(g.astype(cdt), wpr,
                            preferred_element_type=jnp.float32) + bpr

    if mlp_chunks == 1:
        x_acc[...] = mlp_block(x1)
    else:
        def body(i, carry):
            r = pl.ds(pl.multiple_of(i * mlp_rows, mlp_rows), mlp_rows)
            x_acc[r, :] = mlp_block(x_acc[r, :])
            return carry
        jax.lax.fori_loop(0, mlp_chunks, body, 0, unroll=mlp_chunks <= 4)

    # Write the output block only once, on the final layer of this batch tile.
    @pl.when(layer == last_layer)
    def _():
        o_ref[...] = x_acc[...].astype(o_ref.dtype)


_PARAM_ORDER = ("ln1_g", "ln1_b", "wq", "bq", "wk", "bk", "wv", "bv",
                "wo", "bo", "ln2_g", "ln2_b", "wfc", "bfc", "wpr", "bpr")


def prepare_params(torch_layout_params, heads, param_dtype=jnp.float32):
    """Stack per-layer PyTorch-layout params into kernel layout.

    Weights are pre-transposed to (in, out), qkv is split, and the attention
    scale 1/sqrt(Dh) is folded into Wq / bq. Weights may be cast to bf16
    (param_dtype); biases / LN affine stay f32.
    """
    E = torch_layout_params[0]["out_w"].shape[0]
    Dh = E // heads
    scale = 1.0 / math.sqrt(Dh)

    def stack(fn, dtype):
        return jnp.stack([fn(p) for p in torch_layout_params]).astype(dtype)

    return {
        "ln1_g": stack(lambda p: p["ln1_g"].reshape(1, E), jnp.float32),
        "ln1_b": stack(lambda p: p["ln1_b"].reshape(1, E), jnp.float32),
        "wq":    stack(lambda p: p["in_proj_w"][:E].T * scale, param_dtype),
        "bq":    stack(lambda p: (p["in_proj_b"][:E] * scale).reshape(1, E), jnp.float32),
        "wk":    stack(lambda p: p["in_proj_w"][E:2 * E].T, param_dtype),
        "bk":    stack(lambda p: p["in_proj_b"][E:2 * E].reshape(1, E), jnp.float32),
        "wv":    stack(lambda p: p["in_proj_w"][2 * E:].T, param_dtype),
        "bv":    stack(lambda p: p["in_proj_b"][2 * E:].reshape(1, E), jnp.float32),
        "wo":    stack(lambda p: p["out_w"].T, param_dtype),
        "bo":    stack(lambda p: p["out_b"].reshape(1, E), jnp.float32),
        "ln2_g": stack(lambda p: p["ln2_g"].reshape(1, E), jnp.float32),
        "ln2_b": stack(lambda p: p["ln2_b"].reshape(1, E), jnp.float32),
        "wfc":   stack(lambda p: p["fc_w"].T, param_dtype),
        "bfc":   stack(lambda p: p["fc_b"].reshape(1, 4 * E), jnp.float32),
        "wpr":   stack(lambda p: p["proj_w"].T, param_dtype),
        "bpr":   stack(lambda p: p["proj_b"].reshape(1, E), jnp.float32),
    }


def _vmem_limit_bytes():
    """Per-generation VMEM cap: ~52 MiB on v7x (64 MiB/TC physical, leave headroom),
    ~100 MiB on v5e/v6e (128 MiB physical)."""
    kind = ""
    try:
        kind = jax.devices()[0].device_kind.lower()
    except Exception:
        pass
    if "v7" in kind or "tpu7" in kind:
        return 52 * 1024 * 1024
    if "v5" in kind or "v6" in kind:
        return 100 * 1024 * 1024
    return 64 * 1024 * 1024


def _pick_mlp_rows(t_rows, target):
    """Largest row-chunk <= target that divides t_rows and is a multiple of 8."""
    if t_rows <= target:
        return t_rows
    for c in range(min(target, t_rows), 7, -1):
        if t_rows % c == 0 and c % 8 == 0:
            return c
    return t_rows


def transformer_forward(x, prepared, heads, *, batch_tiles=None, mlp_chunk_rows=256):
    """Transformer.forward: x is (L, N, E) like torch's batch_first=False MHA."""
    L, N, E = x.shape
    assert E % heads == 0
    layers = prepared["wq"].shape[0]
    T = N * L

    # Batch tiling for megacore (v7x): outer "parallel" grid axis.
    if batch_tiles is None:
        batch_tiles = 2 if (N % 2 == 0 and N >= 2) else 1
    if N % batch_tiles != 0 or ((N // batch_tiles) * L) % 8 != 0:
        batch_tiles = 1                     # full-array block is always legal
    Nb = N // batch_tiles
    Tb = Nb * L

    mlp_rows = _pick_mlp_rows(Tb, mlp_chunk_rows)
    mlp_chunks = Tb // mlp_rows

    # Lane-dense token slab, batch-major rows: (N*L, E).
    x2d = jnp.transpose(x, (1, 0, 2)).reshape(T, E)

    args = [prepared[k] for k in _PARAM_ORDER]

    def param_spec(a):
        nd = a.ndim
        return pl.BlockSpec((1,) + a.shape[1:],
                            lambda b, l, nd=nd: (l,) + (0,) * (nd - 1))

    in_specs = [pl.BlockSpec((Tb, E), lambda b, l: (b, 0))] + [param_spec(a) for a in args]
    out_specs = pl.BlockSpec((Tb, E), lambda b, l: (b, 0))

    grid_spec = pltpu.PrefetchScalarGridSpec(
        num_scalar_prefetch=0,
        grid=(batch_tiles, layers),          # batch tiles parallel, layers sequential
        in_specs=in_specs,
        out_specs=out_specs,
        scratch_shapes=[pltpu.VMEM((Tb, E), jnp.float32),   # f32 residual carry
                        pltpu.VMEM((Tb, E), jnp.float32)],  # per-layer attention slab
    )

    out2d = pl.pallas_call(
        functools.partial(transformer_stack_kernel,
                          seq_len=L, batch=Nb, heads=heads,
                          mlp_rows=mlp_rows, mlp_chunks=mlp_chunks),
        out_shape=jax.ShapeDtypeStruct((T, E), x.dtype),
        grid_spec=grid_spec,
        compiler_params=pltpu.CompilerParams(
            dimension_semantics=("parallel", "arbitrary"),
            vmem_limit_bytes=_vmem_limit_bytes(),
        ),
    )(x2d, *args)

    return out2d.reshape(N, L, E).transpose(1, 0, 2)


def init_block_params(key, width):
    """Deterministic synthetic parameters (PyTorch layout) for one block."""
    E = width
    ks = jax.random.split(key, 12)
    w = lambda k, shape: 0.02 * jax.random.normal(k, shape, jnp.float32)
    return {
        "ln1_g": 1.0 + 0.1 * jax.random.normal(ks[0], (E,), jnp.float32),
        "ln1_b": 0.1 * jax.random.normal(ks[1], (E,), jnp.float32),
        "in_proj_w": w(ks[2], (3 * E, E)),   # attn.in_proj_weight
        "in_proj_b": w(ks[3], (3 * E,)),     # attn.in_proj_bias
        "out_w": w(ks[4], (E, E)),           # attn.out_proj.weight
        "out_b": w(ks[5], (E,)),
        "ln2_g": 1.0 + 0.1 * jax.random.normal(ks[6], (E,), jnp.float32),
        "ln2_b": 0.1 * jax.random.normal(ks[7], (E,), jnp.float32),
        "fc_w": w(ks[8], (4 * E, E)),        # mlp.c_fc.weight
        "fc_b": w(ks[9], (4 * E,)),
        "proj_w": w(ks[10], (E, 4 * E)),     # mlp.c_proj.weight
        "proj_b": w(ks[11], (E,)),
    }


def ref_block(x, p, heads):
    """Pure-JAX reference mirroring the PyTorch math (torch-layout params)."""
    L, N, E = x.shape
    H, Dh = heads, E // heads

    def ln(t, g, b):
        t = t.astype(jnp.float32)
        mu = t.mean(-1, keepdims=True)
        var = jnp.square(t - mu).mean(-1, keepdims=True)
        return (t - mu) * jax.lax.rsqrt(var + 1e-6) * g + b

    h1 = ln(x, p["ln1_g"], p["ln1_b"])
    qkv = h1 @ p["in_proj_w"].T + p["in_proj_b"]          # (L, N, 3E)
    q, k, v = jnp.split(qkv, 3, axis=-1)
    to_heads = lambda t: t.reshape(L, N, H, Dh).transpose(1, 2, 0, 3)  # (N,H,L,Dh)
    q, k, v = to_heads(q), to_heads(k), to_heads(v)
    s = jnp.einsum("nhld,nhmd->nhlm", q, k) / math.sqrt(Dh)
    a = jax.nn.softmax(s, axis=-1)
    o = jnp.einsum("nhlm,nhmd->nhld", a, v).transpose(2, 0, 1, 3).reshape(L, N, E)
    x1 = x + (o @ p["out_w"].T + p["out_b"])

    h2 = ln(x1, p["ln2_g"], p["ln2_b"])
    fc = h2 @ p["fc_w"].T + p["fc_b"]
    c = math.sqrt(2.0 / math.pi)
    g = 0.5 * fc * (1.0 + jnp.tanh(c * (fc + 0.044715 * fc ** 3)))
    return x1 + (g @ p["proj_w"].T + p["proj_b"])


if __name__ == "__main__":
    # Small shapes: width=32, heads=4, layers=2, seq=8, batch=4.
    L, N, E, HEADS, LAYERS = 8, 4, 32, 4, 2

    key = jax.random.PRNGKey(0)
    kx, kp = jax.random.split(key)
    x = jax.random.normal(kx, (L, N, E), jnp.float32)
    raw_params = [init_block_params(k, E) for k in jax.random.split(kp, LAYERS)]

    # f32 weights here for a tight numerical check; pass param_dtype=jnp.bfloat16
    # for production widths to halve VMEM/DMA bytes.
    prepared = prepare_params(raw_params, HEADS, param_dtype=jnp.float32)

    # mlp_chunk_rows=8 forces the chunked MLP path; default batch_tiles (=2) exercises
    # the parallel batch-tile grid axis.
    out = jax.block_until_ready(
        transformer_forward(x, prepared, HEADS, mlp_chunk_rows=8))

    ref = x
    for p in raw_params:
        ref = ref_block(ref, p, HEADS)
    ref = jax.block_until_ready(ref)

    assert out.shape == (L, N, E) and out.dtype == jnp.float32
    np.testing.assert_allclose(np.asarray(out), np.asarray(ref),
                               rtol=5e-3, atol=5e-3)
    print("KERNEL_OK")
</pallas_src>

<mosaic_0001>
module attributes {stable_mosaic.version = 11 : i64} {
  func.func @transformer_stack_kernel(%arg0: i32, %arg1: i32, %arg2: memref<16x32xf32, #tpu.memory_space<vmem>>, %arg3: memref<1x1x32xf32, #tpu.memory_space<vmem>>, %arg4: memref<1x1x32xf32, #tpu.memory_space<vmem>>, %arg5: memref<1x32x32xf32, #tpu.memory_space<vmem>>, %arg6: memref<1x1x32xf32, #tpu.memory_space<vmem>>, %arg7: memref<1x32x32xf32, #tpu.memory_space<vmem>>, %arg8: memref<1x1x32xf32, #tpu.memory_space<vmem>>, %arg9: memref<1x32x32xf32, #tpu.memory_space<vmem>>, %arg10: memref<1x1x32xf32, #tpu.memory_space<vmem>>, %arg11: memref<1x32x32xf32, #tpu.memory_space<vmem>>, %arg12: memref<1x1x32xf32, #tpu.memory_space<vmem>>, %arg13: memref<1x1x32xf32, #tpu.memory_space<vmem>>, %arg14: memref<1x1x32xf32, #tpu.memory_space<vmem>>, %arg15: memref<1x32x128xf32, #tpu.memory_space<vmem>>, %arg16: memref<1x1x128xf32, #tpu.memory_space<vmem>>, %arg17: memref<1x128x32xf32, #tpu.memory_space<vmem>>, %arg18: memref<1x1x32xf32, #tpu.memory_space<vmem>>, %arg19: memref<16x32xf32, #tpu.memory_space<vmem>>, %arg20: memref<16x32xf32, #tpu.memory_space<vmem>>, %arg21: memref<16x32xf32, #tpu.memory_space<vmem>>) attributes {dimension_semantics = [#tpu.dimension_semantics<parallel>, #tpu.dimension_semantics<arbitrary>], iteration_bounds = array<i64: 2, 2>, scalar_prefetch = 0 : i64, scratch_operands = 2 : i64, tpu.core_type = #tpu.core_type<tc>, window_params = [{transform_indices = @transform_0, window_bounds = array<i64: 16, 32>}, {transform_indices = @transform_1, window_bounds = array<i64: 1, 1, 32>}, {transform_indices = @transform_2, window_bounds = array<i64: 1, 1, 32>}, {transform_indices = @transform_3, window_bounds = array<i64: 1, 32, 32>}, {transform_indices = @transform_4, window_bounds = array<i64: 1, 1, 32>}, {transform_indices = @transform_5, window_bounds = array<i64: 1, 32, 32>}, {transform_indices = @transform_6, window_bounds = array<i64: 1, 1, 32>}, {transform_indices = @transform_7, window_bounds = array<i64: 1, 32, 32>}, {transform_indices = @transform_8, window_bounds = array<i64: 1, 1, 32>}, {transform_indices = @transform_9, window_bounds = array<i64: 1, 32, 32>}, {transform_indices = @transform_10, window_bounds = array<i64: 1, 1, 32>}, {transform_indices = @transform_11, window_bounds = array<i64: 1, 1, 32>}, {transform_indices = @transform_12, window_bounds = array<i64: 1, 1, 32>}, {transform_indices = @transform_13, window_bounds = array<i64: 1, 32, 128>}, {transform_indices = @transform_14, window_bounds = array<i64: 1, 1, 128>}, {transform_indices = @transform_15, window_bounds = array<i64: 1, 128, 32>}, {transform_indices = @transform_16, window_bounds = array<i64: 1, 1, 32>}, {transform_indices = @transform_17, window_bounds = array<i64: 16, 32>}]} {
    %c0_i32 = arith.constant 0 : i32
    %0 = arith.cmpi eq, %arg1, %c0_i32 : i32
    %1 = arith.extui %0 : i1 to i32
    %c0_i32_0 = arith.constant 0 : i32
    %2 = arith.cmpi ne, %1, %c0_i32_0 : i32
    scf.if %2 {
      %c0_113 = arith.constant 0 : index
      %c0_114 = arith.constant 0 : index
      %252 = vector.load %arg2[%c0_113, %c0_114] : memref<16x32xf32, #tpu.memory_space<vmem>>, vector<16x32xf32>
      %c0_115 = arith.constant 0 : index
      %c0_116 = arith.constant 0 : index
      %253 = vector.load %arg20[%c0_115, %c0_116] : memref<16x32xf32, #tpu.memory_space<vmem>>, vector<16x32xf32>
      tpu.vector_store %arg20[%c0_115, %c0_116], %252 {strides = array<i32>} : memref<16x32xf32, #tpu.memory_space<vmem>>, vector<16x32xf32>,
    } else {
    }
    %c0 = arith.constant 0 : index
    %c0_1 = arith.constant 0 : index
    %3 = vector.load %arg20[%c0, %c0_1] : memref<16x32xf32, #tpu.memory_space<vmem>>, vector<16x32xf32>
    %c0_2 = arith.constant 0 : index
    %c0_3 = arith.constant 0 : index
    %c0_4 = arith.constant 0 : index
    %4 = vector.load %arg3[%c0_2, %c0_3, %c0_4] : memref<1x1x32xf32, #tpu.memory_space<vmem>>, vector<1x1x32xf32>
    %5 = vector.shape_cast %4 : vector<1x1x32xf32> to vector<1x32xf32>
    %c0_5 = arith.constant 0 : index
    %c0_6 = arith.constant 0 : index
    %c0_7 = arith.constant 0 : index
    %6 = vector.load %arg4[%c0_5, %c0_6, %c0_7] : memref<1x1x32xf32, #tpu.memory_space<vmem>>, vector<1x1x32xf32>
    %7 = vector.shape_cast %6 : vector<1x1x32xf32> to vector<1x32xf32>
    %cst = arith.constant dense<0.000000e+00> : vector<16xf32>
    %8 = vector.multi_reduction <add>, %3, %cst [1] : vector<16x32xf32> to vector<16xf32>
    %9 = vector.shape_cast %8 : vector<16xf32> to vector<16x1xf32>
    %cst_8 = arith.constant 3.200000e+01 : f32
    %10 = vector.broadcast %cst_8 : f32 to vector<16x1xf32>
    %11 = arith.divf %9, %10 : vector<16x1xf32>
    %12 = vector.broadcast %11 : vector<16x1xf32> to vector<16x32xf32>
    %13 = arith.subf %3, %12 : vector<16x32xf32>
    %14 = arith.mulf %13, %13 : vector<16x32xf32>
    %cst_9 = arith.constant dense<0.000000e+00> : vector<16xf32>
    %15 = vector.multi_reduction <add>, %14, %cst_9 [1] : vector<16x32xf32> to vector<16xf32>
    %16 = vector.shape_cast %15 : vector<16xf32> to vector<16x1xf32>
    %cst_10 = arith.constant 3.200000e+01 : f32
    %17 = vector.broadcast %cst_10 : f32 to vector<16x1xf32>
    %18 = arith.divf %16, %17 : vector<16x1xf32>
    %19 = vector.broadcast %11 : vector<16x1xf32> to vector<16x32xf32>
    %20 = arith.subf %3, %19 : vector<16x32xf32>
    %cst_11 = arith.constant 9.99999997E-7 : f32
    %21 = vector.broadcast %cst_11 : f32 to vector<16x1xf32>
    %22 = arith.addf %18, %21 : vector<16x1xf32>
    %23 = math.rsqrt %22 : vector<16x1xf32>
    %24 = vector.broadcast %23 : vector<16x1xf32> to vector<16x32xf32>
    %25 = arith.mulf %20, %24 : vector<16x32xf32>
    %26 = vector.broadcast %5 : vector<1x32xf32> to vector<16x32xf32>
    %27 = arith.mulf %25, %26 : vector<16x32xf32>
    %28 = vector.broadcast %7 : vector<1x32xf32> to vector<16x32xf32>
    %29 = arith.addf %27, %28 : vector<16x32xf32>
    %c0_12 = arith.constant 0 : index
    %c0_13 = arith.constant 0 : index
    %c0_14 = arith.constant 0 : index
    %30 = vector.load %arg5[%c0_12, %c0_13, %c0_14] : memref<1x32x32xf32, #tpu.memory_space<vmem>>, vector<1x32x32xf32>
    %31 = vector.shape_cast %30 : vector<1x32x32xf32> to vector<32x32xf32>
    %cst_15 = arith.constant dense<0.000000e+00> : vector<16x32xf32>
    %32 = tpu.matmul %29, %31, %cst_15 {dimension_numbers = #tpu.dot_dimension_numbers<[1], [0], [0], [1], [0, 0, 1, 1], [], []>} : vector<16x32xf32>, vector<32x32xf32>, vector<16x32xf32> -> vector<16x32xf32>
    %c0_16 = arith.constant 0 : index
    %c0_17 = arith.constant 0 : index
    %c0_18 = arith.constant 0 : index
    %33 = vector.load %arg6[%c0_16, %c0_17, %c0_18] : memref<1x1x32xf32, #tpu.memory_space<vmem>>, vector<1x1x32xf32>
    %34 = vector.shape_cast %33 : vector<1x1x32xf32> to vector<1x32xf32>
    %35 = vector.broadcast %34 : vector<1x32xf32> to vector<16x32xf32>
    %36 = arith.addf %32, %35 : vector<16x32xf32>
    %c0_19 = arith.constant 0 : index
    %c0_20 = arith.constant 0 : index
    %c0_21 = arith.constant 0 : index
    %37 = vector.load %arg7[%c0_19, %c0_20, %c0_21] : memref<1x32x32xf32, #tpu.memory_space<vmem>>, vector<1x32x32xf32>
    %38 = vector.shape_cast %37 : vector<1x32x32xf32> to vector<32x32xf32>
    %cst_22 = arith.constant dense<0.000000e+00> : vector<16x32xf32>
    %39 = tpu.matmul %29, %38, %cst_22 {dimension_numbers = #tpu.dot_dimension_numbers<[1], [0], [0], [1], [0, 0, 1, 1], [], []>} : vector<16x32xf32>, vector<32x32xf32>, vector<16x32xf32> -> vector<16x32xf32>
    %c0_23 = arith.constant 0 : index
    %c0_24 = arith.constant 0 : index
    %c0_25 = arith.constant 0 : index
    %40 = vector.load %arg8[%c0_23, %c0_24, %c0_25] : memref<1x1x32xf32, #tpu.memory_space<vmem>>, vector<1x1x32xf32>
    %41 = vector.shape_cast %40 : vector<1x1x32xf32> to vector<1x32xf32>
    %42 = vector.broadcast %41 : vector<1x32xf32> to vector<16x32xf32>
    %43 = arith.addf %39, %42 : vector<16x32xf32>
    %c0_26 = arith.constant 0 : index
    %c0_27 = arith.constant 0 : index
    %c0_28 = arith.constant 0 : index
    %44 = vector.load %arg9[%c0_26, %c0_27, %c0_28] : memref<1x32x32xf32, #tpu.memory_space<vmem>>, vector<1x32x32xf32>
    %45 = vector.shape_cast %44 : vector<1x32x32xf32> to vector<32x32xf32>
    %cst_29 = arith.constant dense<0.000000e+00> : vector<16x32xf32>
    %46 = tpu.matmul %29, %45, %cst_29 {dimension_numbers = #tpu.dot_dimension_numbers<[1], [0], [0], [1], [0, 0, 1, 1], [], []>} : vector<16x32xf32>, vector<32x32xf32>, vector<16x32xf32> -> vector<16x32xf32>
    %c0_30 = arith.constant 0 : index
    %c0_31 = arith.constant 0 : index
    %c0_32 = arith.constant 0 : index
    %47 = vector.load %arg10[%c0_30, %c0_31, %c0_32] : memref<1x1x32xf32, #tpu.memory_space<vmem>>, vector<1x1x32xf32>
    %48 = vector.shape_cast %47 : vector<1x1x32xf32> to vector<1x32xf32>
    %49 = vector.broadcast %48 : vector<1x32xf32> to vector<16x32xf32>
    %50 = arith.addf %46, %49 : vector<16x32xf32>
    %51 = vector.extract_strided_slice %36 {offsets = [0, 0], sizes = [16, 8], strides = [1, 1]} : vector<16x32xf32> to vector<16x8xf32>
    %52 = vector.shape_cast %51 : vector<16x8xf32> to vector<2x8x8xf32>
    %53 = vector.extract_strided_slice %43 {offsets = [0, 0], sizes = [16, 8], strides = [1, 1]} : vector<16x32xf32> to vector<16x8xf32>
    %54 = vector.shape_cast %53 : vector<16x8xf32> to vector<2x8x8xf32>
    %55 = vector.extract_strided_slice %50 {offsets = [0, 0], sizes = [16, 8], strides = [1, 1]} : vector<16x32xf32> to vector<16x8xf32>
    %56 = vector.shape_cast %55 : vector<16x8xf32> to vector<2x8x8xf32>
    "tpu.trace_start"() <{level = 10 : i32, message = "nld,nmd->nlm"}> : () -> ()
    %cst_33 = arith.constant dense<0.000000e+00> : vector<2x8x8xf32>
    %57 = tpu.matmul %52, %54, %cst_33 {dimension_numbers = #tpu.dot_dimension_numbers<[2], [2], [1], [1], [0, 0, 0, 1, 1, 1], [0], [0]>} : vector<2x8x8xf32>, vector<2x8x8xf32>, vector<2x8x8xf32> -> vector<2x8x8xf32>
    "tpu.trace_stop"() : () -> ()
    %cst_34 = arith.constant dense<0xFF800000> : vector<2x8xf32>
    %58 = vector.multi_reduction <maximumf>, %57, %cst_34 [2] : vector<2x8x8xf32> to vector<2x8xf32>
    %59 = vector.shape_cast %58 : vector<2x8xf32> to vector<2x8x1xf32>
    %60 = vector.broadcast %59 : vector<2x8x1xf32> to vector<2x8x8xf32>
    %61 = arith.subf %57, %60 : vector<2x8x8xf32>
    %62 = math.exp %61 : vector<2x8x8xf32>
    %cst_35 = arith.constant dense<0.000000e+00> : vector<2x8xf32>
    %63 = vector.multi_reduction <add>, %62, %cst_35 [2] : vector<2x8x8xf32> to vector<2x8xf32>
    %64 = vector.shape_cast %63 : vector<2x8xf32> to vector<2x8x1xf32>
    %65 = tpu.reciprocal %64 {approx = true} : vector<2x8x1xf32> -> vector<2x8x1xf32>
    %66 = vector.broadcast %65 : vector<2x8x1xf32> to vector<2x8x8xf32>
    %67 = arith.mulf %62, %66 : vector<2x8x8xf32>
    "tpu.trace_start"() <{level = 10 : i32, message = "nlm,nmd->nld"}> : () -> ()
    %cst_36 = arith.constant dense<0.000000e+00> : vector<2x8x8xf32>
    %68 = tpu.matmul %67, %56, %cst_36 {dimension_numbers = #tpu.dot_dimension_numbers<[2], [1], [1], [2], [0, 0, 0, 1, 1, 2], [0], [0]>} : vector<2x8x8xf32>, vector<2x8x8xf32>, vector<2x8x8xf32> -> vector<2x8x8xf32>
    "tpu.trace_stop"() : () -> ()
    %69 = vector.shape_cast %68 : vector<2x8x8xf32> to vector<16x8xf32>
    %c0_37 = arith.constant 0 : index
    %c0_38 = arith.constant 0 : index
    %70 = vector.load %arg21[%c0_37, %c0_38] : memref<16x32xf32, #tpu.memory_space<vmem>>, vector<16x8xf32>
    tpu.vector_store %arg21[%c0_37, %c0_38], %69 {strides = array<i32>} : memref<16x32xf32, #tpu.memory_space<vmem>>, vector<16x8xf32>,
    %71 = vector.extract_strided_slice %36 {offsets = [0, 8], sizes = [16, 8], strides = [1, 1]} : vector<16x32xf32> to vector<16x8xf32>
    %72 = vector.shape_cast %71 : vector<16x8xf32> to vector<2x8x8xf32>
    %73 = vector.extract_strided_slice %43 {offsets = [0, 8], sizes = [16, 8], strides = [1, 1]} : vector<16x32xf32> to vector<16x8xf32>
    %74 = vector.shape_cast %73 : vector<16x8xf32> to vector<2x8x8xf32>
    %75 = vector.extract_strided_slice %50 {offsets = [0, 8], sizes = [16, 8], strides = [1, 1]} : vector<16x32xf32> to vector<16x8xf32>
    %76 = vector.shape_cast %75 : vector<16x8xf32> to vector<2x8x8xf32>
    "tpu.trace_start"() <{level = 10 : i32, message = "nld,nmd->nlm"}> : () -> ()
    %cst_39 = arith.constant dense<0.000000e+00> : vector<2x8x8xf32>
    %77 = tpu.matmul %72, %74, %cst_39 {dimension_numbers = #tpu.dot_dimension_numbers<[2], [2], [1], [1], [0, 0, 0, 1, 1, 1], [0], [0]>} : vector<2x8x8xf32>, vector<2x8x8xf32>, vector<2x8x8xf32> -> vector<2x8x8xf32>
    "tpu.trace_stop"() : () -> ()
    %cst_40 = arith.constant dense<0xFF800000> : vector<2x8xf32>
    %78 = vector.multi_reduction <maximumf>, %77, %cst_40 [2] : vector<2x8x8xf32> to vector<2x8xf32>
    %79 = vector.shape_cast %78 : vector<2x8xf32> to vector<2x8x1xf32>
    %80 = vector.broadcast %79 : vector<2x8x1xf32> to vector<2x8x8xf32>
    %81 = arith.subf %77, %80 : vector<2x8x8xf32>
    %82 = math.exp %81 : vector<2x8x8xf32>
    %cst_41 = arith.constant dense<0.000000e+00> : vector<2x8xf32>
    %83 = vector.multi_reduction <add>, %82, %cst_41 [2] : vector<2x8x8xf32> to vector<2x8xf32>
    %84 = vector.shape_cast %83 : vector<2x8xf32> to vector<2x8x1xf32>
    %85 = tpu.reciprocal %84 {approx = true} : vector<2x8x1xf32> -> vector<2x8x1xf32>
    %86 = vector.broadcast %85 : vector<2x8x1xf32> to vector<2x8x8xf32>
    %87 = arith.mulf %82, %86 : vector<2x8x8xf32>
    "tpu.trace_start"() <{level = 10 : i32, message = "nlm,nmd->nld"}> : () -> ()
    %cst_42 = arith.constant dense<0.000000e+00> : vector<2x8x8xf32>
    %88 = tpu.matmul %87, %76, %cst_42 {dimension_numbers = #tpu.dot_dimension_numbers<[2], [1], [1], [2], [0, 0, 0, 1, 1, 2], [0], [0]>} : vector<2x8x8xf32>, vector<2x8x8xf32>, vector<2x8x8xf32> -> vector<2x8x8xf32>
    "tpu.trace_stop"() : () -> ()
    %89 = vector.shape_cast %88 : vector<2x8x8xf32> to vector<16x8xf32>
    %c0_43 = arith.constant 0 : index
    %c8 = arith.constant 8 : index
    %90 = vector.load %arg21[%c0_43, %c8] : memref<16x32xf32, #tpu.memory_space<vmem>>, vector<16x8xf32>
    tpu.vector_store %arg21[%c0_43, %c8], %89 {strides = array<i32>} : memref<16x32xf32, #tpu.memory_space<vmem>>, vector<16x8xf32>,
    %91 = vector.extract_strided_slice %36 {offsets = [0, 16], sizes = [16, 8], strides = [1, 1]} : vector<16x32xf32> to vector<16x8xf32>
    %92 = vector.shape_cast %91 : vector<16x8xf32> to vector<2x8x8xf32>
    %93 = vector.extract_strided_slice %43 {offsets = [0, 16], sizes = [16, 8], strides = [1, 1]} : vector<16x32xf32> to vector<16x8xf32>
    %94 = vector.shape_cast %93 : vector<16x8xf32> to vector<2x8x8xf32>
    %95 = vector.extract_strided_slice %50 {offsets = [0, 16], sizes = [16, 8], strides = [1, 1]} : vector<16x32xf32> to vector<16x8xf32>
    %96 = vector.shape_cast %95 : vector<16x8xf32> to vector<2x8x8xf32>
    "tpu.trace_start"() <{level = 10 : i32, message = "nld,nmd->nlm"}> : () -> ()
    %cst_44 = arith.constant dense<0.000000e+00> : vector<2x8x8xf32>
    %97 = tpu.matmul %92, %94, %cst_44 {dimension_numbers = #tpu.dot_dimension_numbers<[2], [2], [1], [1], [0, 0, 0, 1, 1, 1], [0], [0]>} : vector<2x8x8xf32>, vector<2x8x8xf32>, vector<2x8x8xf32> -> vector<2x8x8xf32>
    "tpu.trace_stop"() : () -> ()
    %cst_45 = arith.constant dense<0xFF800000> : vector<2x8xf32>
    %98 = vector.multi_reduction <maximumf>, %97, %cst_45 [2] : vector<2x8x8xf32> to vector<2x8xf32>
    %99 = vector.shape_cast %98 : vector<2x8xf32> to vector<2x8x1xf32>
    %100 = vector.broadcast %99 : vector<2x8x1xf32> to vector<2x8x8xf32>
    %101 = arith.subf %97, %100 : vector<2x8x8xf32>
    %102 = math.exp %101 : vector<2x8x8xf32>
    %cst_46 = arith.constant dense<0.000000e+00> : vector<2x8xf32>
    %103 = vector.multi_reduction <add>, %102, %cst_46 [2] : vector<2x8x8xf32> to vector<2x8xf32>
    %104 = vector.shape_cast %103 : vector<2x8xf32> to vector<2x8x1xf32>
    %105 = tpu.reciprocal %104 {approx = true} : vector<2x8x1xf32> -> vector<2x8x1xf32>
    %106 = vector.broadcast %105 : vector<2x8x1xf32> to vector<2x8x8xf32>
    %107 = arith.mulf %102, %106 : vector<2x8x8xf32>
    "tpu.trace_start"() <{level = 10 : i32, message = "nlm,nmd->nld"}> : () -> ()
    %cst_47 = arith.constant dense<0.000000e+00> : vector<2x8x8xf32>
    %108 = tpu.matmul %107, %96, %cst_47 {dimension_numbers = #tpu.dot_dimension_numbers<[2], [1], [1], [2], [0, 0, 0, 1, 1, 2], [0], [0]>} : vector<2x8x8xf32>, vector<2x8x8xf32>, vector<2x8x8xf32> -> vector<2x8x8xf32>
    "tpu.trace_stop"() : () -> ()
    %109 = vector.shape_cast %108 : vector<2x8x8xf32> to vector<16x8xf32>
    %c0_48 = arith.constant 0 : index
    %c16 = arith.constant 16 : index
    %110 = vector.load %arg21[%c0_48, %c16] : memref<16x32xf32, #tpu.memory_space<vmem>>, vector<16x8xf32>
    tpu.vector_store %arg21[%c0_48, %c16], %109 {strides = array<i32>} : memref<16x32xf32, #tpu.memory_space<vmem>>, vector<16x8xf32>,
    %111 = vector.extract_strided_slice %36 {offsets = [0, 24], sizes = [16, 8], strides = [1, 1]} : vector<16x32xf32> to vector<16x8xf32>
    %112 = vector.shape_cast %111 : vector<16x8xf32> to vector<2x8x8xf32>
    %113 = vector.extract_strided_slice %43 {offsets = [0, 24], sizes = [16, 8], strides = [1, 1]} : vector<16x32xf32> to vector<16x8xf32>
    %114 = vector.shape_cast %113 : vector<16x8xf32> to vector<2x8x8xf32>
    %115 = vector.extract_strided_slice %50 {offsets = [0, 24], sizes = [16, 8], strides = [1, 1]} : vector<16x32xf32> to vector<16x8xf32>
    %116 = vector.shape_cast %115 : vector<16x8xf32> to vector<2x8x8xf32>
    "tpu.trace_start"() <{level = 10 : i32, message = "nld,nmd->nlm"}> : () -> ()
    %cst_49 = arith.constant dense<0.000000e+00> : vector<2x8x8xf32>
    %117 = tpu.matmul %112, %114, %cst_49 {dimension_numbers = #tpu.dot_dimension_numbers<[2], [2], [1], [1], [0, 0, 0, 1, 1, 1], [0], [0]>} : vector<2x8x8xf32>, vector<2x8x8xf32>, vector<2x8x8xf32> -> vector<2x8x8xf32>
    "tpu.trace_stop"() : () -> ()
    %cst_50 = arith.constant dense<0xFF800000> : vector<2x8xf32>
    %118 = vector.multi_reduction <maximumf>, %117, %cst_50 [2] : vector<2x8x8xf32> to vector<2x8xf32>
    %119 = vector.shape_cast %118 : vector<2x8xf32> to vector<2x8x1xf32>
    %120 = vector.broadcast %119 : vector<2x8x1xf32> to vector<2x8x8xf32>
    %121 = arith.subf %117, %120 : vector<2x8x8xf32>
    %122 = math.exp %121 : vector<2x8x8xf32>
    %cst_51 = arith.constant dense<0.000000e+00> : vector<2x8xf32>
    %123 = vector.multi_reduction <add>, %122, %cst_51 [2] : vector<2x8x8xf32> to vector<2x8xf32>
    %124 = vector.shape_cast %123 : vector<2x8xf32> to vector<2x8x1xf32>
    %125 = tpu.reciprocal %124 {approx = true} : vector<2x8x1xf32> -> vector<2x8x1xf32>
    %126 = vector.broadcast %125 : vector<2x8x1xf32> to vector<2x8x8xf32>
    %127 = arith.mulf %122, %126 : vector<2x8x8xf32>
    "tpu.trace_start"() <{level = 10 : i32, message = "nlm,nmd->nld"}> : () -> ()
    %cst_52 = arith.constant dense<0.000000e+00> : vector<2x8x8xf32>
    %128 = tpu.matmul %127, %116, %cst_52 {dimension_numbers = #tpu.dot_dimension_numbers<[2], [1], [1], [2], [0, 0, 0, 1, 1, 2], [0], [0]>} : vector<2x8x8xf32>, vector<2x8x8xf32>, vector<2x8x8xf32> -> vector<2x8x8xf32>
    "tpu.trace_stop"() : () -> ()
    %129 = vector.shape_cast %128 : vector<2x8x8xf32> to vector<16x8xf32>
    %c0_53 = arith.constant 0 : index
    %c24 = arith.constant 24 : index
    %130 = vector.load %arg21[%c0_53, %c24] : memref<16x32xf32, #tpu.memory_space<vmem>>, vector<16x8xf32>
    tpu.vector_store %arg21[%c0_53, %c24], %129 {strides = array<i32>} : memref<16x32xf32, #tpu.memory_space<vmem>>, vector<16x8xf32>,
    %c0_54 = arith.constant 0 : index
    %c0_55 = arith.constant 0 : index
    %131 = vector.load %arg21[%c0_54, %c0_55] : memref<16x32xf32, #tpu.memory_space<vmem>>, vector<16x32xf32>
    %c0_56 = arith.constant 0 : index
    %c0_57 = arith.constant 0 : index
    %c0_58 = arith.constant 0 : index
    %132 = vector.load %arg11[%c0_56, %c0_57, %c0_58] : memref<1x32x32xf32, #tpu.memory_space<vmem>>, vector<1x32x32xf32>
    %133 = vector.shape_cast %132 : vector<1x32x32xf32> to vector<32x32xf32>
    %cst_59 = arith.constant dense<0.000000e+00> : vector<16x32xf32>
    %134 = tpu.matmul %131, %133, %cst_59 {dimension_numbers = #tpu.dot_dimension_numbers<[1], [0], [0], [1], [0, 0, 1, 1], [], []>} : vector<16x32xf32>, vector<32x32xf32>, vector<16x32xf32> -> vector<16x32xf32>
    %c0_60 = arith.constant 0 : index
    %c0_61 = arith.constant 0 : index
    %c0_62 = arith.constant 0 : index
    %135 = vector.load %arg12[%c0_60, %c0_61, %c0_62] : memref<1x1x32xf32, #tpu.memory_space<vmem>>, vector<1x1x32xf32>
    %136 = vector.shape_cast %135 : vector<1x1x32xf32> to vector<1x32xf32>
    %137 = vector.broadcast %136 : vector<1x32xf32> to vector<16x32xf32>
    %138 = arith.addf %134, %137 : vector<16x32xf32>
    %139 = arith.addf %3, %138 : vector<16x32xf32>
    %c0_63 = arith.constant 0 : index
    %c0_64 = arith.constant 0 : index
    %140 = vector.load %arg20[%c0_63, %c0_64] : memref<16x32xf32, #tpu.memory_space<vmem>>, vector<16x32xf32>
    tpu.vector_store %arg20[%c0_63, %c0_64], %139 {strides = array<i32>} : memref<16x32xf32, #tpu.memory_space<vmem>>, vector<16x32xf32>,
    %c0_65 = arith.constant 0 : index
    %c0_66 = arith.constant 0 : index
    %c0_67 = arith.constant 0 : index
    %141 = vector.load %arg13[%c0_65, %c0_66, %c0_67] : memref<1x1x32xf32, #tpu.memory_space<vmem>>, vector<1x1x32xf32>
    %142 = vector.shape_cast %141 : vector<1x1x32xf32> to vector<1x32xf32>
    %c0_68 = arith.constant 0 : index
    %c0_69 = arith.constant 0 : index
    %c0_70 = arith.constant 0 : index
    %143 = vector.load %arg14[%c0_68, %c0_69, %c0_70] : memref<1x1x32xf32, #tpu.memory_space<vmem>>, vector<1x1x32xf32>
    %144 = vector.shape_cast %143 : vector<1x1x32xf32> to vector<1x32xf32>
    %c0_71 = arith.constant 0 : index
    %c0_72 = arith.constant 0 : index
    %c0_73 = arith.constant 0 : index
    %145 = vector.load %arg15[%c0_71, %c0_72, %c0_73] : memref<1x32x128xf32, #tpu.memory_space<vmem>>, vector<1x32x128xf32>
    %146 = vector.shape_cast %145 : vector<1x32x128xf32> to vector<32x128xf32>
    %c0_74 = arith.constant 0 : index
    %c0_75 = arith.constant 0 : index
    %c0_76 = arith.constant 0 : index
    %147 = vector.load %arg16[%c0_74, %c0_75, %c0_76] : memref<1x1x128xf32, #tpu.memory_space<vmem>>, vector<1x1x128xf32>
    %148 = vector.shape_cast %147 : vector<1x1x128xf32> to vector<1x128xf32>
    %c0_77 = arith.constant 0 : index
    %c0_78 = arith.constant 0 : index
    %c0_79 = arith.constant 0 : index
    %149 = vector.load %arg17[%c0_77, %c0_78, %c0_79] : memref<1x128x32xf32, #tpu.memory_space<vmem>>, vector<1x128x32xf32>
    %150 = vector.shape_cast %149 : vector<1x128x32xf32> to vector<128x32xf32>
    %c0_80 = arith.constant 0 : index
    %c0_81 = arith.constant 0 : index
    %c0_82 = arith.constant 0 : index
    %151 = vector.load %arg18[%c0_80, %c0_81, %c0_82] : memref<1x1x32xf32, #tpu.memory_space<vmem>>, vector<1x1x32xf32>
    %152 = vector.shape_cast %151 : vector<1x1x32xf32> to vector<1x32xf32>
    %c0_i32_83 = arith.constant 0 : i32
    %c8_i32 = arith.constant 8 : i32
    %153 = arith.muli %c0_i32_83, %c8_i32 : i32
    %154 = tpu.assume_multiple %153, 8 : i32
    %155 = arith.index_cast %154 : i32 to index
    %c0_84 = arith.constant 0 : index
    %156 = vector.load %arg20[%155, %c0_84] : memref<16x32xf32, #tpu.memory_space<vmem>>, vector<8x32xf32>
    %cst_85 = arith.constant dense<0.000000e+00> : vector<8xf32>
    %157 = vector.multi_reduction <add>, %156, %cst_85 [1] : vector<8x32xf32> to vector<8xf32>
    %158 = vector.shape_cast %157 : vector<8xf32> to vector<8x1xf32>
    %cst_86 = arith.constant 3.200000e+01 : f32
    %159 = vector.broadcast %cst_86 : f32 to vector<8x1xf32>
    %160 = arith.divf %158, %159 : vector<8x1xf32>
    %161 = vector.broadcast %160 : vector<8x1xf32> to vector<8x32xf32>
    %162 = arith.subf %156, %161 : vector<8x32xf32>
    %163 = arith.mulf %162, %162 : vector<8x32xf32>
    %cst_87 = arith.constant dense<0.000000e+00> : vector<8xf32>
    %164 = vector.multi_reduction <add>, %163, %cst_87 [1] : vector<8x32xf32> to vector<8xf32>
    %165 = vector.shape_cast %164 : vector<8xf32> to vector<8x1xf32>
    %cst_88 = arith.constant 3.200000e+01 : f32
    %166 = vector.broadcast %cst_88 : f32 to vector<8x1xf32>
    %167 = arith.divf %165, %166 : vector<8x1xf32>
    %168 = vector.broadcast %160 : vector<8x1xf32> to vector<8x32xf32>
    %169 = arith.subf %156, %168 : vector<8x32xf32>
    %cst_89 = arith.constant 9.99999997E-7 : f32
    %170 = vector.broadcast %cst_89 : f32 to vector<8x1xf32>
    %171 = arith.addf %167, %170 : vector<8x1xf32>
    %172 = math.rsqrt %171 : vector<8x1xf32>
    %173 = vector.broadcast %172 : vector<8x1xf32> to vector<8x32xf32>
    %174 = arith.mulf %169, %173 : vector<8x32xf32>
    %175 = vector.broadcast %142 : vector<1x32xf32> to vector<8x32xf32>
    %176 = arith.mulf %174, %175 : vector<8x32xf32>
    %177 = vector.broadcast %144 : vector<1x32xf32> to vector<8x32xf32>
    %178 = arith.addf %176, %177 : vector<8x32xf32>
    %cst_90 = arith.constant dense<0.000000e+00> : vector<8x128xf32>
    %179 = tpu.matmul %178, %146, %cst_90 {dimension_numbers = #tpu.dot_dimension_numbers<[1], [0], [0], [1], [0, 0, 1, 1], [], []>} : vector<8x32xf32>, vector<32x128xf32>, vector<8x128xf32> -> vector<8x128xf32>
    %180 = vector.broadcast %148 : vector<1x128xf32> to vector<8x128xf32>
    %181 = arith.addf %179, %180 : vector<8x128xf32>
    %cst_91 = arith.constant 5.000000e-01 : f32
    %182 = vector.broadcast %cst_91 : f32 to vector<8x128xf32>
    %183 = arith.mulf %182, %181 : vector<8x128xf32>
    %cst_92 = arith.constant 4.471500e-02 : f32
    %184 = vector.broadcast %cst_92 : f32 to vector<8x128xf32>
    %185 = arith.mulf %184, %181 : vector<8x128xf32>
    %186 = arith.mulf %185, %181 : vector<8x128xf32>
    %187 = arith.mulf %186, %181 : vector<8x128xf32>
    %188 = arith.addf %181, %187 : vector<8x128xf32>
    %cst_93 = arith.constant 0.797884583 : f32
    %189 = vector.broadcast %cst_93 : f32 to vector<8x128xf32>
    %190 = arith.mulf %189, %188 : vector<8x128xf32>
    %191 = math.tanh %190 : vector<8x128xf32>
    %cst_94 = arith.constant 1.000000e+00 : f32
    %192 = vector.broadcast %cst_94 : f32 to vector<8x128xf32>
    %193 = arith.addf %192, %191 : vector<8x128xf32>
    %194 = arith.mulf %183, %193 : vector<8x128xf32>
    %cst_95 = arith.constant dense<0.000000e+00> : vector<8x32xf32>
    %195 = tpu.matmul %194, %150, %cst_95 {dimension_numbers = #tpu.dot_dimension_numbers<[1], [0], [0], [1], [0, 0, 1, 1], [], []>} : vector<8x128xf32>, vector<128x32xf32>, vector<8x32xf32> -> vector<8x32xf32>
    %196 = arith.addf %156, %195 : vector<8x32xf32>
    %197 = vector.broadcast %152 : vector<1x32xf32> to vector<8x32xf32>
    %198 = arith.addf %196, %197 : vector<8x32xf32>
    %199 = arith.index_cast %154 : i32 to index
    %c0_96 = arith.constant 0 : index
    %200 = vector.load %arg20[%199, %c0_96] : memref<16x32xf32, #tpu.memory_space<vmem>>, vector<8x32xf32>
    tpu.vector_store %arg20[%199, %c0_96], %198 {strides = array<i32>} : memref<16x32xf32, #tpu.memory_space<vmem>>, vector<8x32xf32>,
    %c1_i32 = arith.constant 1 : i32
    %c8_i32_97 = arith.constant 8 : i32
    %201 = arith.muli %c1_i32, %c8_i32_97 : i32
    %202 = tpu.assume_multiple %201, 8 : i32
    %203 = arith.index_cast %202 : i32 to index
    %c0_98 = arith.constant 0 : index
    %204 = vector.load %arg20[%203, %c0_98] : memref<16x32xf32, #tpu.memory_space<vmem>>, vector<8x32xf32>
    %cst_99 = arith.constant dense<0.000000e+00> : vector<8xf32>
    %205 = vector.multi_reduction <add>, %204, %cst_99 [1] : vector<8x32xf32> to vector<8xf32>
    %206 = vector.shape_cast %205 : vector<8xf32> to vector<8x1xf32>
    %cst_100 = arith.constant 3.200000e+01 : f32
    %207 = vector.broadcast %cst_100 : f32 to vector<8x1xf32>
    %208 = arith.divf %206, %207 : vector<8x1xf32>
    %209 = vector.broadcast %208 : vector<8x1xf32> to vector<8x32xf32>
    %210 = arith.subf %204, %209 : vector<8x32xf32>
    %211 = arith.mulf %210, %210 : vector<8x32xf32>
    %cst_101 = arith.constant dense<0.000000e+00> : vector<8xf32>
    %212 = vector.multi_reduction <add>, %211, %cst_101 [1] : vector<8x32xf32> to vector<8xf32>
    %213 = vector.shape_cast %212 : vector<8xf32> to vector<8x1xf32>
    %cst_102 = arith.constant 3.200000e+01 : f32
    %214 = vector.broadcast %cst_102 : f32 to vector<8x1xf32>
    %215 = arith.divf %213, %214 : vector<8x1xf32>
    %216 = vector.broadcast %208 : vector<8x1xf32> to vector<8x32xf32>
    %217 = arith.subf %204, %216 : vector<8x32xf32>
    %cst_103 = arith.constant 9.99999997E-7 : f32
    %218 = vector.broadcast %cst_103 : f32 to vector<8x1xf32>
    %219 = arith.addf %215, %218 : vector<8x1xf32>
    %220 = math.rsqrt %219 : vector<8x1xf32>
    %221 = vector.broadcast %220 : vector<8x1xf32> to vector<8x32xf32>
    %222 = arith.mulf %217, %221 : vector<8x32xf32>
    %223 = vector.broadcast %142 : vector<1x32xf32> to vector<8x32xf32>
    %224 = arith.mulf %222, %223 : vector<8x32xf32>
    %225 = vector.broadcast %144 : vector<1x32xf32> to vector<8x32xf32>
    %226 = arith.addf %224, %225 : vector<8x32xf32>
    %cst_104 = arith.constant dense<0.000000e+00> : vector<8x128xf32>
    %227 = tpu.matmul %226, %146, %cst_104 {dimension_numbers = #tpu.dot_dimension_numbers<[1], [0], [0], [1], [0, 0, 1, 1], [], []>} : vector<8x32xf32>, vector<32x128xf32>, vector<8x128xf32> -> vector<8x128xf32>
    %228 = vector.broadcast %148 : vector<1x128xf32> to vector<8x128xf32>
    %229 = arith.addf %227, %228 : vector<8x128xf32>
    %cst_105 = arith.constant 5.000000e-01 : f32
    %230 = vector.broadcast %cst_105 : f32 to vector<8x128xf32>
    %231 = arith.mulf %230, %229 : vector<8x128xf32>
    %cst_106 = arith.constant 4.471500e-02 : f32
    %232 = vector.broadcast %cst_106 : f32 to vector<8x128xf32>
    %233 = arith.mulf %232, %229 : vector<8x128xf32>
    %234 = arith.mulf %233, %229 : vector<8x128xf32>
    %235 = arith.mulf %234, %229 : vector<8x128xf32>
    %236 = arith.addf %229, %235 : vector<8x128xf32>
    %cst_107 = arith.constant 0.797884583 : f32
    %237 = vector.broadcast %cst_107 : f32 to vector<8x128xf32>
    %238 = arith.mulf %237, %236 : vector<8x128xf32>
    %239 = math.tanh %238 : vector<8x128xf32>
    %cst_108 = arith.constant 1.000000e+00 : f32
    %240 = vector.broadcast %cst_108 : f32 to vector<8x128xf32>
    %241 = arith.addf %240, %239 : vector<8x128xf32>
    %242 = arith.mulf %231, %241 : vector<8x128xf32>
    %cst_109 = arith.constant dense<0.000000e+00> : vector<8x32xf32>
    %243 = tpu.matmul %242, %150, %cst_109 {dimension_numbers = #tpu.dot_dimension_numbers<[1], [0], [0], [1], [0, 0, 1, 1], [], []>} : vector<8x128xf32>, vector<128x32xf32>, vector<8x32xf32> -> vector<8x32xf32>
    %244 = arith.addf %204, %243 : vector<8x32xf32>
    %245 = vector.broadcast %152 : vector<1x32xf32> to vector<8x32xf32>
    %246 = arith.addf %244, %245 : vector<8x32xf32>
    %247 = arith.index_cast %202 : i32 to index
    %c0_110 = arith.constant 0 : index
    %248 = vector.load %arg20[%247, %c0_110] : memref<16x32xf32, #tpu.memory_space<vmem>>, vector<8x32xf32>
    tpu.vector_store %arg20[%247, %c0_110], %246 {strides = array<i32>} : memref<16x32xf32, #tpu.memory_space<vmem>>, vector<8x32xf32>,
    %c2_i32 = arith.constant 2 : i32
    %c1_i32_111 = arith.constant 1 : i32
    %249 = arith.cmpi eq, %arg1, %c1_i32_111 : i32
    %250 = arith.extui %249 : i1 to i32
    %c0_i32_112 = arith.constant 0 : i32
    %251 = arith.cmpi ne, %250, %c0_i32_112 : i32
    scf.if %251 {
      %c0_113 = arith.constant 0 : index
      %c0_114 = arith.constant 0 : index
      %252 = vector.load %arg20[%c0_113, %c0_114] : memref<16x32xf32, #tpu.memory_space<vmem>>, vector<16x32xf32>
      %c0_115 = arith.constant 0 : index
      %c0_116 = arith.constant 0 : index
      %253 = vector.load %arg19[%c0_115, %c0_116] : memref<16x32xf32, #tpu.memory_space<vmem>>, vector<16x32xf32>
      tpu.vector_store %arg19[%c0_115, %c0_116], %252 {strides = array<i32>} : memref<16x32xf32, #tpu.memory_space<vmem>>, vector<16x32xf32>,
    } else {
    }
    return
  }
  func.func @transform_0(%arg0: i32, %arg1: i32) -> (i32, i32) {
    %c0_i32 = arith.constant 0 : i32
    %c0_i32_0 = arith.constant 0 : i32
    return %arg0, %c0_i32 : i32, i32
  }
  func.func @transform_1(%arg0: i32, %arg1: i32) -> (i32, i32, i32) {
    %c0_i32 = arith.constant 0 : i32
    %c0_i32_0 = arith.constant 0 : i32
    %c0_i32_1 = arith.constant 0 : i32
    return %arg1, %c0_i32, %c0_i32_0 : i32, i32, i32
  }
  func.func @transform_2(%arg0: i32, %arg1: i32) -> (i32, i32, i32) {
    %c0_i32 = arith.constant 0 : i32
    %c0_i32_0 = arith.constant 0 : i32
    %c0_i32_1 = arith.constant 0 : i32
    return %arg1, %c0_i32, %c0_i32_0 : i32, i32, i32
  }
  func.func @transform_3(%arg0: i32, %arg1: i32) -> (i32, i32, i32) {
    %c0_i32 = arith.constant 0 : i32
    %c0_i32_0 = arith.constant 0 : i32
    %c0_i32_1 = arith.constant 0 : i32
    return %arg1, %c0_i32, %c0_i32_0 : i32, i32, i32
  }
  func.func @transform_4(%arg0: i32, %arg1: i32) -> (i32, i32, i32) {
    %c0_i32 = arith.constant 0 : i32
    %c0_i32_0 = arith.constant 0 : i32
    %c0_i32_1 = arith.constant 0 : i32
    return %arg1, %c0_i32, %c0_i32_0 : i32, i32, i32
  }
  func.func @transform_5(%arg0: i32, %arg1: i32) -> (i32, i32, i32) {
    %c0_i32 = arith.constant 0 : i32
    %c0_i32_0 = arith.constant 0 : i32
    %c0_i32_1 = arith.constant 0 : i32
    return %arg1, %c0_i32, %c0_i32_0 : i32, i32, i32
  }
  func.func @transform_6(%arg0: i32, %arg1: i32) -> (i32, i32, i32) {
    %c0_i32 = arith.constant 0 : i32
    %c0_i32_0 = arith.constant 0 : i32
    %c0_i32_1 = arith.constant 0 : i32
    return %arg1, %c0_i32, %c0_i32_0 : i32, i32, i32
  }
  func.func @transform_7(%arg0: i32, %arg1: i32) -> (i32, i32, i32) {
    %c0_i32 = arith.constant 0 : i32
    %c0_i32_0 = arith.constant 0 : i32
    %c0_i32_1 = arith.constant 0 : i32
    return %arg1, %c0_i32, %c0_i32_0 : i32, i32, i32
  }
  func.func @transform_8(%arg0: i32, %arg1: i32) -> (i32, i32, i32) {
    %c0_i32 = arith.constant 0 : i32
    %c0_i32_0 = arith.constant 0 : i32
    %c0_i32_1 = arith.constant 0 : i32
    return %arg1, %c0_i32, %c0_i32_0 : i32, i32, i32
  }
  func.func @transform_9(%arg0: i32, %arg1: i32) -> (i32, i32, i32) {
    %c0_i32 = arith.constant 0 : i32
    %c0_i32_0 = arith.constant 0 : i32
    %c0_i32_1 = arith.constant 0 : i32
    return %arg1, %c0_i32, %c0_i32_0 : i32, i32, i32
  }
  func.func @transform_10(%arg0: i32, %arg1: i32) -> (i32, i32, i32) {
    %c0_i32 = arith.constant 0 : i32
    %c0_i32_0 = arith.constant 0 : i32
    %c0_i32_1 = arith.constant 0 : i32
    return %arg1, %c0_i32, %c0_i32_0 : i32, i32, i32
  }
  func.func @transform_11(%arg0: i32, %arg1: i32) -> (i32, i32, i32) {
    %c0_i32 = arith.constant 0 : i32
    %c0_i32_0 = arith.constant 0 : i32
    %c0_i32_1 = arith.constant 0 : i32
    return %arg1, %c0_i32, %c0_i32_0 : i32, i32, i32
  }
  func.func @transform_12(%arg0: i32, %arg1: i32) -> (i32, i32, i32) {
    %c0_i32 = arith.constant 0 : i32
    %c0_i32_0 = arith.constant 0 : i32
    %c0_i32_1 = arith.constant 0 : i32
    return %arg1, %c0_i32, %c0_i32_0 : i32, i32, i32
  }
  func.func @transform_13(%arg0: i32, %arg1: i32) -> (i32, i32, i32) {
    %c0_i32 = arith.constant 0 : i32
    %c0_i32_0 = arith.constant 0 : i32
    %c0_i32_1 = arith.constant 0 : i32
    return %arg1, %c0_i32, %c0_i32_0 : i32, i32, i32
  }
  func.func @transform_14(%arg0: i32, %arg1: i32) -> (i32, i32, i32) {
    %c0_i32 = arith.constant 0 : i32
    %c0_i32_0 = arith.constant 0 : i32
    %c0_i32_1 = arith.constant 0 : i32
    return %arg1, %c0_i32, %c0_i32_0 : i32, i32, i32
  }
  func.func @transform_15(%arg0: i32, %arg1: i32) -> (i32, i32, i32) {
    %c0_i32 = arith.constant 0 : i32
    %c0_i32_0 = arith.constant 0 : i32
    %c0_i32_1 = arith.constant 0 : i32
    return %arg1, %c0_i32, %c0_i32_0 : i32, i32, i32
  }
  func.func @transform_16(%arg0: i32, %arg1: i32) -> (i32, i32, i32) {
    %c0_i32 = arith.constant 0 : i32
    %c0_i32_0 = arith.constant 0 : i32
    %c0_i32_1 = arith.constant 0 : i32
    return %arg1, %c0_i32, %c0_i32_0 : i32, i32, i32
  }
  func.func @transform_17(%arg0: i32, %arg1: i32) -> (i32, i32) {
    %c0_i32 = arith.constant 0 : i32
    %c0_i32_0 = arith.constant 0 : i32
    return %arg0, %c0_i32 : i32, i32
  }
}

</mosaic_0001>

<bundles_post_ra>
// kernel: tpu_custom_call.1
= control target key start
LH: loop header
LB: loop body
LE: loop exit
PB: predicated region body
PF: predicated region fallthrough
CT: control target
= control target key end

     0   :  { %s3389_s0 = inlined_call_operand.hbm [shape: f32[32,32], index: 0, kind: input, shape index: {}]   ;;  %s3390_s1 = inlined_call_operand.hbm [shape: f32[2,1,32], index: 1, kind: input, shape index: {}]   ;;  %s3391_s2 = inlined_call_operand.hbm [shape: f32[2,1,32], index: 2, kind: input, shape index: {}]   ;;  %s3392_s3 = inlined_call_operand.vmem [shape: f32[2,32,32], index: 3, kind: input, shape index: {}]   ;;  %s3393_s4 = inlined_call_operand.vmem [shape: f32[2,1,32], index: 4, kind: input, shape index: {}]   ;;  %s3394_s5 = inlined_call_operand.vmem [shape: f32[2,32,32], index: 5, kind: input, shape index: {}]   ;;  %s3395_s6 = inlined_call_operand.hbm [shape: f32[2,1,32], index: 6, kind: input, shape index: {}]   ;;  %s3396_s7 = inlined_call_operand.vmem [shape: f32[2,32,32], index: 7, kind: input, shape index: {}]   ;;  %s3397_s8 = inlined_call_operand.vmem [shape: f32[2,1,32], index: 8, kind: input, shape index: {}]   ;;  %s3398_s9 = inlined_call_operand.vmem [shape: f32[2,32,32], index: 9, kind: input, shape index: {}]   ;;  %s3399_s10 = inlined_call_operand.vmem [shape: f32[2,1,32], index: 10, kind: input, shape index: {}]   ;;  %s3400_s11 = inlined_call_operand.hbm [shape: f32[2,1,32], index: 11, kind: input, shape index: {}]   ;;  %s3401_s12 = inlined_call_operand.vmem [shape: f32[2,1,32], index: 12, kind: input, shape index: {}]   ;;  %s3402_s13 = inlined_call_operand.vmem [shape: f32[2,32,128], index: 13, kind: input, shape index: {}]   ;;  %s3403_s14 = inlined_call_operand.vmem [shape: f32[2,1,128], index: 14, kind: input, shape index: {}]   ;;  %s3404_s15 = inlined_call_operand.vmem [shape: f32[2,128,32], index: 15, kind: input, shape index: {}]   ;;  %s3405_s16 = inlined_call_operand.vmem [shape: f32[2,1,32], index: 16, kind: input, shape index: {}]   ;;  %s3406_s17 = inlined_call_operand.hbm [shape: f32[32,32], index: 17, kind: output, shape index: {}]  }
   0x1   :  { %3427 = sst [smem:[#allocation35_spill]] %s3389_s0 }
   0x2   :  { %3428 = sst [smem:[#allocation36_spill]] %s3390_s1 }
   0x3   :  { %3429 = sst [smem:[#allocation37_spill]] %s3391_s2 }
   0x4   :  { %3430 = sst [smem:[#allocation38_spill]] %s3392_s3 }
   0x5   :  { %3431 = sst [smem:[#allocation39_spill]] %s3393_s4 }
   0x6   :  { %3432 = sst [smem:[#allocation40_spill]] %s3394_s5 }
   0x7   :  { %3433 = sst [smem:[#allocation41_spill]] %s3395_s6 }
   0x8   :  { %3434 = sst [smem:[#allocation42_spill]] %s3396_s7 }
   0x9   :  { %3435 = sst [smem:[#allocation43_spill]] %s3397_s8 }
   0xa   :  { %3436 = sst [smem:[#allocation44_spill]] %s3398_s9 }
   0xb   :  { %3437 = sst [smem:[#allocation45_spill]] %s3399_s10 }
   0xc   :  { %3438 = sst [smem:[#allocation46_spill]] %s3400_s11 }
   0xd   :  { %3439 = sst [smem:[#allocation47_spill]] %s3401_s12 }
   0xe   :  { %3440 = sst [smem:[#allocation48_spill]] %s3402_s13 }
   0xf   :  { %3441 = sst [smem:[#allocation49_spill]] %s3403_s14 }
  0x10   :  { %3442 = sst [smem:[#allocation50_spill]] %s3404_s15 }
  0x11   :  { %3443 = sst [smem:[#allocation51_spill]] %s3405_s16 }
  0x12   :  { %3444 = sst [smem:[#allocation52_spill]] %s3406_s17 }
  0x13   :  { %22 = vsyncpa [#allocation5], 0 }
  0x14   :  { %24 = vsyncpa [#allocation5 + $0x1], 0 }
  0x15   :  { %25 = vsyncpa [#allocation8], 0 }
  0x16   :  { %27 = vsyncpa [#allocation8 + $0x1], 0 }
  0x17   :  { %28 = vsyncpa [#allocation11], 0 }
  0x18   :  { %30 = vsyncpa [#allocation11 + $0x1], 0 }
  0x19   :  { %31 = vsyncpa [#allocation6], 0 }
  0x1a   :  { %33 = vsyncpa [#allocation6 + $0x1], 0  ;;  %s2833_s24 = smov 0   ;;  %s2835_s25 = smov 0  }
  0x1b   :  { %s2837_s26 = smov 0   ;;  %s2839_s27 = smov 0  }
  0x1c   :  { %s2841_s28 = smov 0   ;;  %s2843_s29 = smov 0  }
  0x1d   :  { %s2845_s0 = smov 0   ;;  %s2847_s30 = smov 0  }
  0x1e   :  { %s2849_s18 = smov 0   ;;  %s2851_s19 = smov 0  }
  0x1f   :  { %s2853_s1 = smov 0  }
  0x20 LB: > { %3445 = sst [smem:[#allocation18_spill]] %s2695_s25  ;;  %s2887_s20 = sadd.s32 4294967295, %s2731_s1   ;;  %s2731_s1 = sphi %s2853_s1, %s39_s1   ;;  %s2727_s19 = sphi %s2851_s19, %s3519_s19   ;;  %s2723_s18 = sphi %s2849_s18, %s3518_s18   ;;  %s2719_s30 = sphi %s2847_s30, %s3517_s30   ;;  %s2715_s0 = sphi %s2845_s0, %s3516_s0   ;;  %s2711_s29 = sphi %s2843_s29, %s3515_s29   ;;  %s2707_s28 = sphi %s2841_s28, %s3514_s28   ;;  %s2703_s27 = sphi %s2839_s27, %s3513_s27   ;;  %s2699_s26 = sphi %s2837_s26, %s3512_s26   ;;  %s2695_s25 = sphi %s2835_s25, %s3511_s25   ;;  %s2691_s24 = sphi %s2833_s24, %s3510_s24  }
  0x21   : > { %3446 = sst [smem:[#allocation19_spill]] %s2699_s26  ;;  %s48_s21 = sadd.s32 1, %s2723_s18 }
  0x22   : > { %3447 = sst [smem:[#allocation20_spill]] %s2703_s27  ;;  %p2890_p0 = scmp.ge.s32.totalorder %s48_s21, 2 }
  0x23   : > { %3448 = sst [smem:[#allocation21_spill]] %s2707_s28  ;;  %p66_p1 = scmp.eq.s32.totalorder %s2731_s1, 0 }
  0x24   : > { %3449 = sst [smem:[#allocation22_spill]] %s2711_s29  ;;  %p72_p2 = scmp.eq.s32.totalorder %s2887_s20, 0 }
  0x25   : > { %3450 = sst [smem:[#allocation23_spill]] %s2715_s0  ;;  %s84_s23 = sadd.s32 1, %s2699_s26 }
  0x26   : > { %3451 = sst [smem:[#allocation24_spill]] %s2719_s30  ;;  %s3521_s21 = smov (%p2890_p0, %s48_s21), 0 }
  0x27   : > { %3452 = sst [smem:[#allocation25_spill]] %s2723_s18  ;;  %p91_p3 = scmp.ne.s32.totalorder %s2699_s26, %s2695_s25 }
  0x28   : > { %3453 = sst [smem:[#allocation26_spill]] %s2727_s19  ;;  %p97_p4 = scmp.ne.s32.totalorder %s2695_s25, %s2691_s24 }
  0x29   : > { %3454 = sst [smem:[#allocation27_spill]] %s2731_s1  ;;  %s81_s17 = ssub.s32 %s2723_s18, %s3521_s21 }
  0x2a   : > { %3456 = sst [smem:[#allocation28_spill]] %s3521_s21  ;;  %p82_p5 = scmp.eq.s32.totalorder %s81_s17, 0 }
  0x2b   : > { %p93_p6 = por %p91_p3, %p66_p1  ;;  %p2910_p7 = por %p97_p4, %p72_p2 }
  0x2c   : > { %p3410_p8 = scmp.lt.s32.totalorder %s2731_s1, 4  ;;  %s559_s15 = sand.u32 1, %s2731_s1  }
  0x2d   : > { %s3457_s30 = scalar_select %p2910_p7, 1, 0 }
  0x2e   : > { %s2916_s16 = scalar_select %p82_p5, %s2699_s26, %s84_s23  }
  0x2f   : > { %3458 = sst [smem:[#allocation29_spill]] %s3457_s30  ;;  %s2920_s14 = sand.u32 1, %s2699_s26  }
  0x30   : > { %3459 = sst [smem:[#allocation30_spill]] %s2916_s16  ;;  %s562_s21 = scalar_lea.vmem [#allocation7], %s2920_s14 }
  0x31   : > { %s3460_s12 = sld [smem:[#allocation36_spill]]  ;;  %s569_s10 = sshll.u32 %s562_s21, 4  ;;  %s570_s10 = int_to_ptr.vmem [resolvable:$true] %s569_s10 }
  0x32   : > { %p2929_p9 = pnand %p3410_p8, %p93_p6  ;;  %p2194_p10 = scmp.ge.s32.totalorder %s2731_s1, 1 }
  0x33   : > { %p709_p11 = scmp.lt.s32.totalorder %s2731_s1, 5  ;;  %s3463_s6 = sld [smem:[#allocation41_spill]] }
  0x34   : > { %s618_s16 = scalar_lea.vmem [#allocation10], %s2920_s14  ;;  %s2949_s7 = scalar_lea.sflag [#allocation11], %s559_s15 }
  0x35   : > { %p2940_p12 = pnand %p2194_p10, %p709_p11  ;;  %s625_s26 = sshll.u32 %s618_s16, 4  ;;  %s626_s26 = int_to_ptr.vmem [resolvable:$true] %s625_s26 }
  0x36   : > { %s58_s5 = sadd.s32 1, %s2711_s29  ;;  %p65_p13 = scmp.ne.s32.totalorder %s2711_s29, %s2707_s28 }
  0x37   : > { %s565_s17 = scalar_lea.hbm %s3460_s12, %s2723_s18  ;;  %s2935_s12 = scalar_lea.sflag [#allocation8], %s559_s15 }
  0x38   : > { %s567_s9 = sshll.u32 %s565_s17, 4  ;;  %p71_p3 = scmp.ne.s32.totalorder %s2707_s28, %s2703_s27  ;;  %s568_s9 = int_to_ptr.hbm [resolvable:$true] %s567_s9 }
  0x39   : > { %2276 = dma.hbm_to_vmem [thread:$0]  (!%p2929_p9), %s568_s9, 16, %s570_s10, %s2935_s12  }
  0x3a   : > { %s621_s17 = scalar_lea.hbm %s3463_s6, %s2723_s18  ;;  %s2188_s9 = sadd.s32 4294967294, %s2731_s1  }
  0x3b   : > { %s623_s8 = sshll.u32 %s621_s17, 4  ;;  %s51_s10 = sadd.s32 1, %s2727_s19  ;;  %s624_s8 = int_to_ptr.hbm [resolvable:$true] %s623_s8 }
  0x3c   : > { %2282 = dma.hbm_to_vmem [thread:$0]  (!%p2929_p9), %s624_s8, 16, %s626_s26, %s2949_s7  }
  0x3d   : > { %s3523_s10 = smov (!%p2890_p0, %s51_s10), %s2727_s19  ;;  %p511_p5 = scmp.eq.s32.totalorder %s2887_s20, 3 }
  0x3e   : > { %p53_p4 = scmp.ge.s32.totalorder %s3523_s10, 2  ;;  %p2967_p6 = por %p66_p1, %p65_p13 }
  0x3f   : > { %p2973_p10 = por %p72_p2, %p71_p3  ;;  %p2979_p0 = por %p511_p5, %p65_p13 }
  0x40   : > { %s3525_s10 = smov (%p53_p4, %s3523_s10), 0  ;;  %p517_p11 = scmp.eq.s32.totalorder %s2188_s9, 3 }
  0x41   : > { %3466 = sst [smem:[#allocation31_spill]] %s3525_s10  ;;  %s55_s26 = ssub.s32 %s2727_s19, %s3525_s10 }
  0x42   : > { %s3467_s8 = scalar_select %p2979_p0, 1, 0 }
  0x43   : > { %s537_s22 = sand.u32 1, %s2711_s29   ;;  %p56_p1 = scmp.eq.s32.totalorder %s55_s26, 0 }
  0x44   : > { %3468 = sst [smem:[#allocation32_spill]] %s3467_s8  ;;  %p2986_p8 = por %p517_p11, %p71_p3 }
  0x45   : > { %s2191_s24 = sshll.u32 %s537_s22, 4  ;;  %s2250_s6 = sshll.u32 %s2727_s19, 4 }
  0x46   : > { %s3469_s21 = scalar_select %p2986_p8, 1, 0 }
  0x47   : > { %s2991_s17 = scalar_select %p56_p1, %s2711_s29, %s58_s5  }
  0x48   : > { %3470 = sst [smem:[#allocation33_spill]] %s3469_s21  ;;  %s541_s30 = scalar_lea.vmem [#allocation4], %s2191_s24 }
  0x49   : > { %3471 = sst [smem:[#allocation34_spill]] %s2991_s17  ;;  %s549_s9 = sshll.u32 %s541_s30, 4  ;;  %s550_s9 = int_to_ptr.vmem [resolvable:$true] %s549_s9 }
  0x4a   : > { %s3472_s4 = sld [smem:[#allocation35_spill]]  ;;  %p3473_p2 = scmp.lt.s32.totalorder %s2731_s1, 4 }
  0x4b   : > { %s538_s10 = scalar_lea.sflag [#allocation5], %s537_s22  ;;  %s2733_s5 = smov 128  }
  0x4c   : > { %p2271_p13 = pnand %p3473_p2, %p2967_p6  ;;  %s2734_s19 = smov 8  }
  0x4d   : > { %s3474_s2 = sld [smem:[#allocation37_spill]]  ;;  %s579_s27 = scalar_lea.vmem [#allocation9], %s2920_s14 }
  0x4e   : > { %s586_s30 = sshll.u32 %s579_s27, 4  ;;  %s3475_s11 = sld [smem:[#allocation46_spill]]  ;;  %s587_s30 = int_to_ptr.vmem [resolvable:$true] %s586_s30 }
  0x4f   : > { %s663_s17 = scalar_lea.vmem [#allocation12], %s2920_s14 }
  0x50   : > { %s546_s0 = scalar_lea.hbm %s3472_s4, %s2250_s6  ;;  %s670_s29 = sshll.u32 %s663_s17, 4  ;;  %s671_s29 = int_to_ptr.vmem [resolvable:$true] %s670_s29 }
  0x51   : > { %s547_s26 = sshll.u32 %s546_s0, 4  ;;  %s548_s26 = int_to_ptr.hbm [resolvable:$true] %s547_s26 }
  0x52   : > { %2273 = dma.hbm_to_vmem [thread:$0]  (!%p2271_p13), %s548_s26, 256, %s550_s9, %s538_s10, %s2733_s5, %s2733_s5, %s2734_s19  }
  0x53   : > { %s582_s6 = scalar_lea.hbm %s3474_s2, %s2723_s18  ;;  %713 = sbr.rel (%p2940_p12) target bundleno = 2325 (0x915), region = 88 }
  0x54   : > { %s584_s24 = sshll.u32 %s582_s6, 4  ;;  %s666_s22 = scalar_lea.hbm %s3475_s11, %s2723_s18  ;;  %s585_s24 = int_to_ptr.hbm [resolvable:$true] %s584_s24 }
  0x55   : > { %2279 = dma.hbm_to_vmem [thread:$0]  (!%p2929_p9), %s585_s24, 16, %s587_s30, %s2935_s12  }
  0x56   : > { %s668_s21 = sshll.u32 %s666_s22, 4  ;;  %s3020_s19 = sand.u32 (!%p2940_p12), 1, %s2707_s28   ;;  %s669_s21 = int_to_ptr.hbm [resolvable:$true] %s668_s21 }
  0x57   : > { %2285 = dma.hbm_to_vmem [thread:$0]  (!%p2929_p9), %s669_s21, 16, %s671_s29, %s2949_s7  }
  0x58   : > { %s3419_s12 = sshll.u32 %s3020_s19, 4  ;;  %s716_s10 = scalar_lea.sflag [#allocation5], %s3020_s19 }
  0x59   : > { %s3026_s14 = scalar_lea.vmem [#allocation4], %s3419_s12 }
  0x5a   : > { %2674 = dma.done.wait (%p2973_p10), %s716_s10, 256  }
  0x5b   : > { %2676 = vsyncadd (%p2973_p10), %s716_s10, 4294967040  ;;  %s725_s29 = sand.u32 1, %s2887_s20   ;;  %s3034_s23 = sand.u32 1, %s2695_s25  }
  0x5c   : > { %s726_s13 = scalar_lea.sflag [#allocation8], %s725_s29 }
  0x5d   : > { %2678 = dma.done.wait (%p2910_p7), %s726_s13, 32  }
  0x5e   : > { %2680 = vsyncadd (%p2910_p7), %s726_s13, 4294967264  ;;  %s744_s15 = scalar_lea.sflag [#allocation11], %s725_s29 }
  0x5f   : > { %2682 = dma.done.wait (%p2910_p7), %s744_s15, 32  }
  0x60   : > { %2684 = vsyncadd (%p2910_p7), %s744_s15, 4294967264  ;;  %s3477_s20 = sld [smem:[#allocation23_spill]]  ;;  %s755_s18 = scalar_lea.vmem [#allocation12], %s3034_s23 }
  0x61   : > { %s3479_s0 = sld [smem:[#allocation38_spill]] }
  0x62   : > { %s3480_s7 = sld [smem:[#allocation40_spill]] }
  0x63   : > { %s3481_s9 = sld [smem:[#allocation42_spill]] }
  0x64   : > { %s3483_s27 = sld [smem:[#allocation44_spill]] }
  0x65   : > { %s3484_s11 = sld [smem:[#allocation45_spill]] }
  0x66   : > { %p872_p9 = scmp.lt.s32.totalorder %s3477_s20, 1  ;;  %s3486_s15 = sld [smem:[#allocation48_spill]] }
  0x67   : > { %s3487_s21 = sld [smem:[#allocation49_spill]]  ;;  %p2209_p7 = scmp.ne.s32.totalorder %s3477_s20, 0 }
  0x68   : > { %s3049_s26 = scalar_select %p872_p9, %s3477_s20, 1 }
  0x69   : > { %s3488_s1 = sld [smem:[#allocation50_spill]] }
  0x6a   : > { %s2251_s5 = sshll.u32 %s3049_s26, 5  ;;  %s2256_s4 = sshll.u32 %s3049_s26, 7 }
  0x6b   : > { %s3059_s16 = scalar_lea.vmem %s3479_s0, %s2251_s5  ;;  %s3064_s29 = scalar_lea.vmem %s3480_s7, %s2251_s5 }
  0x6c   : > { %s3069_s17 = scalar_lea.vmem %s3481_s9, %s2251_s5  ;;  %s3078_s30 = scalar_lea.vmem %s3483_s27, %s2251_s5 }
  0x6d   : > { %s900_s22 = scalar_lea.vmem %s3484_s11, %s3049_s26  ;;  %s3091_s25 = scalar_lea.vmem %s3486_s15, %s2251_s5 }
  0x6e   : > { %s911_s3 = scalar_lea.vmem %s3487_s21, %s3049_s26  ;;  %s3489_s0 = sld [smem:[#allocation51_spill]] }
  0x6f   : > { %s3101_s8 = scalar_lea.vmem %s3488_s1, %s2256_s4  ;;  %s3490_s7 = sshll.u32 %s3020_s19, 4 }
  0x70   : > { %s3110_s28 = scalar_lea.vmem [#allocation13], %s3490_s7  ;;  %924 = sbr.rel (%p2209_p7) target bundleno = 120 (0x78), region = 112 }
  0x74   : > { %s919_s10 = scalar_lea.vmem %s3489_s0, %s3049_s26 }
  0x75   : > { %v925_v0 = vld [vmem:[%s3026_s14] sm:$0xff]  ;;  %vm927_vm0 = vcmask 261120   ;;  %v926_v1 = vld [vmem:[%s3026_s14 + $0x8] sm:$0xff] }
  0x76   : > { %928 = vst.msk [vmem:[#allocation2] sm:$0xff] %vm927_vm0, %v925_v0 }
  0x77   : > { %929 = vst.msk [vmem:[#allocation2 + $0x8] sm:$0xff] %vm927_vm0, %v926_v1 }
  0x78 PF: > { %vm934_vm1 = vcmask 261120   ;;  %v2735_v6 = vmov 32.0   ;;  %v999_v23 = vld [vmem:[%s3059_s16 + $0x18] sm:$0xff]  ;;  %v998_v25 = vld [vmem:[%s3059_s16 + $0x10] sm:$0xff]  ;;  %v997_v27 = vld [vmem:[%s3059_s16 + $0x8] sm:$0xff]  ;;  %s3491_s1 = scalar_lea.vmem [#allocation7], %s3034_s23 }
  0x79   : > { %2405 = vrcp.f32 %v2735_v6  ;;  %v1036_v24 = vld [vmem:[%s3064_s29 + $0x18] sm:$0xff]  ;;  %1022 = vmatpush.msra.mxu0 %v999_v23  ;;  %v1035_v26 = vld [vmem:[%s3064_s29 + $0x10] sm:$0xff]  ;;  %v1034_v28 = vld [vmem:[%s3064_s29 + $0x8] sm:$0xff]  ;;  %s3492_s14 = scalar_lea.vmem [#allocation9], %s3034_s23  ;;  %s3493_s5 = sld [smem:[#allocation39_spill]]  ;;  %vm1095_vm9 = vcmask 64512  }
  0x7a   : > { %1053 = vmatpush.msra.mxu2 %v1036_v24  ;;  %v996_v29 = vld [vmem:[%s3059_s16] sm:$0xff]  ;;  %v1067_v37 = vld [vmem:[%s3069_s17 + $0x18] sm:$0xff]  ;;  %v1066_v38 = vld [vmem:[%s3069_s17 + $0x10] sm:$0xff]  ;;  %s3495_s13 = scalar_lea.vmem [#allocation10], %s3034_s23  ;;  %s2737_s9 = smov 112   ;;  %vm1358_vm10 = vcmask 130112  }
  0x7b   : > { %1023 = vmatpush.msra.mxu0 %v998_v25  ;;  %v1033_v30 = vld [vmem:[%s3064_s29] sm:$0xff]  ;;  %v1065_v39 = vld [vmem:[%s3069_s17 + $0x8] sm:$0xff]  ;;  %s2736_s29 = smov 120   ;;  %s3496_s2 = sld [smem:[#allocation43_spill]]  ;;  %vm1499_vm11 = vcmask 195712   ;;  %vm1640_vm12 = vcmask 261312  }
  0x7c   : > { %1054 = vmatpush.msra.mxu2 %v1035_v26  ;;  %v1064_v40 = vld [vmem:[%s3069_s17] sm:$0xff]  ;;  %s2738_s4 = smov 104   ;;  %s2739_s27 = smov 8  }
  0x7d   : > { %v3117_v3 = vld [vmem:[#allocation2] sm:$0xff]  ;;  %1024 = vmatpush.msra.mxu0 %v997_v27  ;;  %s2740_s6 = smov 16   ;;  %s2741_s11 = smov 24  }
  0x7e   : > { %v3115_v2 = vld [vmem:[#allocation2 + $0x8] sm:$0xff]  ;;  %v935_v5 = vsel %vm934_vm1, %v3117_v3, 0.0  ;;  %1055 = vmatpush.msra.mxu2 %v1034_v28  ;;  %v2395_v53 = vld [vmem:[%s3491_s1] ss:$0 sm:$0xff]  ;;  %s3499_s7 = sld [smem:[#allocation47_spill]] }
  0x7f   : > { %v938_v4 = vsel %vm934_vm1, %v3115_v2, 0.0  ;;  %936 = vadd.xlane.f32.xlu0 %v935_v5  ;;  %v2406_v7 = vpop.eup %2405  ;;  %1025 = vmatpush.msra.mxu0 %v996_v29  ;;  %v2396_v56 = vld [vmem:[%s3492_s14] ss:$0 sm:$0xff]  ;;  %s3494_s16 = scalar_lea.vmem %s3493_s5, %s3049_s26  ;;  %s3503_s20 = sld [smem:[#allocation23_spill]] }
  0x80   : > { %939 = vadd.xlane.f32.xlu1 %v938_v4  ;;  %v942_v8 = vmul.f32 32.0, %v2406_v7  ;;  %vm946_vm2 = vweird.f32 %v2406_v7  ;;  %1056 = vmatpush.msra.mxu2 %v1033_v30  ;;  %v2397_v63 = vld [vmem:[%s3494_s16] ss:$0 sm:$0xff] }
  0x81   : > { %v2398_v4 = vld [vmem:[%s3495_s13] ss:$0 sm:$0xff]  ;;  %s3497_s21 = scalar_lea.vmem %s3496_s2, %s3049_s26 }
  0x82   : > { %v943_v9 = vsub.f32 1.0, %v942_v8  ;;  %1084 = vmatpush.msrb.mxu2 %v1067_v37 }
  0x84   : > { %v944_v10 = vmul.f32 %v2406_v7, %v943_v9  ;;  %1085 = vmatpush.msrb.mxu2 %v1066_v38  ;;  %s3500_s1 = scalar_lea.vmem %s3499_s7, %s3049_s26 }
  0x85   : > { %p2244_p12 = scmp.ne.s32.totalorder %s3503_s20, 1 }
  0x86   : > { %v945_v11 = vadd.f32 %v2406_v7, %v944_v10  ;;  %1086 = vmatpush.msrb.mxu2 %v1065_v39 }
  0x88   : > { %v3123_v12 = vsel %vm946_vm2, %v2406_v7, %v945_v11  ;;  %1087 = vmatpush.msrb.mxu2 %v1064_v40  ;;  %v2399_v11 = vld [vmem:[%s3497_s21] ss:$0 sm:$0xff] }
  0xf2   : > { %v937_v14 = vpop.xlane.xlu0 %936 }
  0xf3   : > { %v940_v13 = vpop.xlane.xlu1 %939  ;;  %v948_v16 = vmul.f32 %v3123_v12, %v937_v14 }
  0xf4   : > { %v949_v15 = vmul.f32 %v3123_v12, %v940_v13 }
  0xf5   : > { %v950_v18 = vsub.f32 %v3117_v3, %v948_v16 }
  0xf6   : > { %v3128_v17 = vsub.f32 %v3115_v2, %v949_v15 }
  0xf7   : > { %v952_v20 = vmul.f32 %v950_v18, %v950_v18 }
  0xf8   : > { %v953_v19 = vmul.f32 %v3128_v17, %v3128_v17 }
  0xf9   : > { %v954_v22 = vsel %vm934_vm1, %v952_v20, 0.0 }
  0xfa   : > { %v957_v21 = vsel %vm934_vm1, %v953_v19, 0.0  ;;  %955 = vadd.xlane.f32.xlu0 %v954_v22 }
  0xfb   : > { %958 = vadd.xlane.f32.xlu1 %v957_v21 }
 0x16d   : > { %v956_v32 = vpop.xlane.xlu0 %955 }
 0x16e   : > { %v959_v31 = vpop.xlane.xlu1 %958  ;;  %v960_v34 = vmul.f32 %v956_v32, %v3123_v12 }
 0x16f   : > { %v961_v33 = vmul.f32 %v959_v31, %v3123_v12 }
 0x170   : > { %v962_v36 = vadd.f32 1e-06, %v960_v34 }
 0x171   : > { %v963_v35 = vadd.f32 1e-06, %v961_v33 }
 0x172   : > { %vm970_vm7 = vweird.f32 %v962_v36 }
 0x173   : > { %2407 = vrsqrt.f32 %v963_v35  ;;  %vm980_vm3 = vweird.f32 %v963_v35 }
 0x174   : > { %2409 = vrsqrt.f32 %v962_v36 }
 0x179   : > { %v2408_v41 = vpop.eup %2407 }
 0x17a   : > { %v2410_v42 = vpop.eup %2409  ;;  %v975_v43 = vmul.f32 %v2408_v41, %v963_v35  ;;  %vm981_vm4 = vweird.f32 %v2408_v41 }
 0x17b   : > { %v965_v44 = vmul.f32 %v2410_v42, %v962_v36  ;;  %vm971_vm5 = vweird.f32 %v2410_v42  ;;  %vm982_vm6 = vmor %vm980_vm3, %vm981_vm4 }
 0x17c   : > { %v976_v45 = vmul.f32 %v2408_v41, %v975_v43  ;;  %vm972_vm8 = vmor %vm970_vm7, %vm971_vm5 }
 0x17d   : > { %v966_v46 = vmul.f32 %v2410_v42, %v965_v44 }
 0x17e   : > { %v977_v47 = vmul.f32 0.5, %v976_v45 }
 0x17f   : > { %v967_v48 = vmul.f32 0.5, %v966_v46 }
 0x180   : > { %v978_v49 = vsub.f32 1.5, %v977_v47 }
 0x181   : > { %v968_v50 = vsub.f32 1.5, %v967_v48 }
 0x182   : > { %v979_v51 = vmul.f32 %v2408_v41, %v978_v49 }
 0x183   : > { %v969_v52 = vmul.f32 %v2410_v42, %v968_v50 }
 0x184   : > { %v983_v57 = vsel %vm982_vm6, %v2408_v41, %v979_v51 }
 0x185   : > { %v973_v54 = vsel %vm972_vm8, %v2410_v42, %v969_v52  ;;  %v985_v60 = vmul.f32 %v983_v57, %v3128_v17 }
 0x186   : > { %v984_v55 = vmul.f32 %v973_v54, %v950_v18 }
 0x187   : > { %v990_v61 = vmul.f32 %v2395_v53, %v985_v60 }
 0x188   : > { %v989_v58 = vmul.f32 %v2395_v53, %v984_v55 }
 0x189   : > { %v995_v62 = vadd.f32 %v2396_v56, %v990_v61 }
 0x18a   : > { %v994_v59 = vadd.f32 %v2396_v56, %v989_v58 }
 0x18c   : > { %2210 = vmatmul.msk.f32.vlgmr.msra.gmra.mxu0 %vm934_vm1, %v994_v59  ;;  %2212 = vmatmul.msk.f32.vlgmr.msra.gmra.mxu2 %vm934_vm1, %v994_v59 }
 0x194   : > { %2211 = vmatmul.msk.f32.gmra.mxu0 %vm934_vm1, %v995_v62  ;;  %2213 = vmatmul.msk.f32.gmra.mxu2 %vm934_vm1, %v995_v62 }
 0x19c   : > { %2214 = vmatmul.msk.f32.vlgmr.msrb.gmra.mxu2 %vm934_vm1, %v994_v59 }
 0x1a4   : > { %2215 = vmatmul.msk.f32.gmra.mxu2 %vm934_vm1, %v995_v62 }
 0x209   : > { %v1027_v0 = vpop.f32.mrf.mxu0 }
 0x20a   : > { %v1028_v1 = vadd.f32 %v2397_v63, %v1027_v0 }
 0x20c   : > { %1218 = vrot.lane.b32.xlu1 %v1028_v1, %s2736_s29 }
 0x20f   : > { %v1058_v5 = vpop.f32.mrf.mxu2 }
 0x210   : > { %v1059_v6 = vadd.f32 %v2398_v4, %v1058_v5 }
 0x211   : > { %v1030_v7 = vpop.f32.mrf.mxu0 }
 0x212   : > { %v1031_v8 = vadd.f32 %v2397_v63, %v1030_v7  ;;  %1363 = vrot.lane.b32.xlu2 %v1059_v6, %s2737_s9  ;;  %1220 = vrot.lane.b32.xlu0 %v1059_v6, %s2736_s29 }
 0x213   : > { %2216 = vmatpush.xpose.msk.msrb.mxu0 %vm1095_vm9, %v1059_v6 }
 0x214   : > { %1246 = vrot.lane.b32.xlu1 %v1031_v8, %s2736_s29 }
 0x216   : > { %2217 = vmatmul.msk.f32.vlgmr.msrb.gmra.mxu0 %vm1095_vm9, %v1028_v1 }
 0x217   : > { %v1061_v9 = vpop.f32.mrf.mxu2 }
 0x218   : > { %v1062_v10 = vadd.f32 %v2398_v4, %v1061_v9 }
 0x21a   : > { %2218 = vmatpush.xpose.msk.msra.mxu3 %vm1095_vm9, %v1062_v10  ;;  %1361 = vrot.lane.b32.xlu0 %v1028_v1, %s2737_s9 }
 0x21c   : > { %1391 = vrot.lane.b32.xlu1 %v1062_v10, %s2737_s9 }
 0x21d   : > { %2219 = vmatmul.msk.f32.vlgmr.msra.gmra.mxu3 %vm1095_vm9, %v1031_v8 }
 0x21f   : > { %v1089_v13 = vpop.f32.mrf.mxu2 }
 0x220   : > { %v3182_v14 = vadd.f32 %v2399_v11, %v1089_v13 }
 0x222   : > { %1188 = vmatpush.msra.mxu1 %v3182_v14  ;;  %1504 = vrot.lane.b32.xlu0 %v1059_v6, %s2738_s4 }
 0x224   : > { %1530 = vrot.lane.b32.xlu1 %v1031_v8, %s2738_s4 }
 0x227   : > { %v1092_v15 = vpop.f32.mrf.mxu2 }
 0x228   : > { %v3187_v16 = vadd.f32 %v2399_v11, %v1092_v15 }
 0x22a   : > { %1211 = vmatpush.msra.mxu0 %v3187_v16  ;;  %1389 = vrot.lane.b32.xlu0 %v1031_v8, %s2737_s9  ;;  %v2390_v59 = vpack.i.bf16 %v3187_v16, %v3182_v14 }
 0x26c   : > { %v1364_v23 = vpop.permute.xlu2 %1363 }
 0x27e   : > { %v1219_v22 = vpop.permute.xlu1 %1218 }
 0x284   : > { %v1221_v17 = vpop.permute.xlu0 %1220 }
 0x285   : > { %2222 = vmatpush.xpose.msk.msrb.mxu1 %vm1095_vm9, %v1221_v17 }
 0x286   : > { %v1247_v24 = vpop.permute.xlu1 %1246 }
 0x28c   : > { %v1362_v25 = vpop.permute.xlu0 %1361 }
 0x28e   : > { %v1392_v30 = vpop.permute.xlu1 %1391 }
 0x293   : > { %v1119_v18 = vpop.f32.mrf.mxu0 }
 0x294   : > { %v1148_v19 = vsel %vm1095_vm9, %v1119_v18, -inf  ;;  %v1505_v31 = vpop.permute.xlu0 %1504 }
 0x295   : > { %1149 = vmax.xlane.f32.xlu2 %v1148_v19 }
 0x296   : > { %v1531_v41 = vpop.permute.xlu1 %1530 }
 0x29c   : > { %v1390_v34 = vpop.permute.xlu0 %1389 }
 0x2a0   : > { %v1145_v20 = vpop.f32.mrf.mxu3 }
 0x2a1   : > { %v1151_v21 = vsel %vm1095_vm9, %v1145_v20, -inf }
 0x2a2   : > { %1152 = vmax.xlane.f32.xlu1 %v1151_v21 }
 0x2ad   : > { %1248 = vrot.lane.b32.xlu2 %v1062_v10, %s2736_s29 }
 0x308   : > { %v1150_v26 = vpop.xlane.xlu2 %1149 }
 0x309   : > { %v1154_v27 = vsub.f32 %v1119_v18, %v1150_v26 }
 0x30b   : > { %v1156_v28 = vmul.f32 1.442695, %v1154_v27 }
 0x30d   : > { %2411 = vpow2.f32 %v1156_v28 }
 0x310   : > { %v1249_v29 = vpop.permute.xlu2 %1248 }
 0x311   : > { %2224 = vmatpush.xpose.msk.msra.mxu2 %vm1095_vm9, %v1249_v29 }
 0x313   : > { %v2412_v32 = vpop.eup %2411 }
 0x314   : > { %2225 = vmatmul.msk.f32.vlgmr.msra.gmra.mxu2 %vm1095_vm9, %v1247_v24  ;;  %v1160_v33 = vsel %vm1095_vm9, %v2412_v32, 0.0 }
 0x315   : > { %2230 = vmatpush.xpose.msk.msrb.mxu2 %vm1095_vm9, %v1392_v30  ;;  %1161 = vadd.xlane.f32.xlu2 %v1160_v33  ;;  %v1153_v47 = vpop.xlane.xlu1 %1152 }
 0x316   : > { %v1155_v48 = vsub.f32 %v1145_v20, %v1153_v47 }
 0x318   : > { %v1158_v53 = vmul.f32 1.442695, %v1155_v48 }
 0x31c   : > { %2231 = vmatmul.msk.f32.vlgmr.msrb.gmra.mxu2 %vm1095_vm9, %v1390_v34 }
 0x32d   : > { %1502 = vrot.lane.b32.xlu2 %v1028_v1, %s2738_s4 }
 0x335   : > { %1532 = vrot.lane.b32.xlu2 %v1062_v10, %s2738_s4 }
 0x388   : > { %v1162_v35 = vpop.xlane.xlu2 %1161 }
 0x389   : > { %2413 = vrcp.f32 %v1162_v35 }
 0x38a   : > { %2415 = vpow2.f32 %v1158_v53 }
 0x38f   : > { %v2414_v36 = vpop.eup %2413 }
 0x390   : > { %v1503_v37 = vpop.permute.xlu2 %1502  ;;  %v1168_v38 = vmul.f32 %v2414_v36, %v2412_v32  ;;  %v2416_v57 = vpop.eup %2415 }
 0x391   : > { %v1163_v58 = vsel %vm1095_vm9, %v2416_v57, 0.0 }
 0x392   : > { %2220 = vmatmul.msk.f32.vlgmr.msra.gmra.mxu1 %vm1095_vm9, %v1168_v38 }
 0x393   : > { %2228 = vmatpush.xpose.msk.msra.mxu1 %vm1095_vm9, %v1364_v23 }
 0x397   : > { %v1271_v39 = vpop.f32.mrf.mxu2 }
 0x398   : > { %v1533_v40 = vpop.permute.xlu2 %1532  ;;  %v1277_v55 = vsel %vm1095_vm9, %v1271_v39, -inf }
 0x399   : > { %2236 = vmatpush.xpose.msk.msra.mxu2 %vm1095_vm9, %v1533_v40 }
 0x39a   : > { %2223 = vmatmul.msk.f32.vlgmr.msrb.gmra.mxu1 %vm1095_vm9, %v1219_v22 }
 0x39b   : > { %2234 = vmatpush.xpose.msk.msrb.mxu1 %vm1095_vm9, %v1505_v31 }
 0x39c   : > { %2237 = vmatmul.msk.f32.vlgmr.msra.gmra.mxu2 %vm1095_vm9, %v1531_v41 }
 0x39f   : > { %v1414_v42 = vpop.f32.mrf.mxu2 }
 0x3a0   : > { %v1420_v43 = vsel %vm1095_vm9, %v1414_v42, -inf }
 0x3a1   : > { %1421 = vmax.xlane.f32.xlu1 %v1420_v43 }
 0x3a2   : > { %2229 = vmatmul.msk.f32.vlgmr.msra.gmra.mxu1 %vm1095_vm9, %v1362_v25 }
 0x3aa   : > { %2235 = vmatmul.msk.f32.vlgmr.msrb.gmra.mxu1 %vm1095_vm9, %v1503_v37 }
 0x40f   : > { %v1190_v44 = vpop.f32.mrf.mxu1 }
 0x410   : > { %1216 = vst.msk [vmem:[#allocation3] sm:$0xff] %vm1095_vm9, %v1190_v44 }
 0x414   : > { %v1422_v8 = vpop.xlane.xlu1 %1421 }
 0x415   : > { %v1424_v13 = vsub.f32 %v1414_v42, %v1422_v8 }
 0x417   : > { %v1243_v45 = vpop.f32.mrf.mxu1  ;;  %v1427_v17 = vmul.f32 1.442695, %v1424_v13 }
 0x418   : > { %v1274_v46 = vsel %vm1095_vm9, %v1243_v45, -inf }
 0x419   : > { %1275 = vmax.xlane.f32.xlu0 %v1274_v46 }
 0x41f   : > { %v1386_v49 = vpop.f32.mrf.mxu1  ;;  %v1555_v50 = vpop.f32.mrf.mxu2 }
 0x420   : > { %v1417_v51 = vsel %vm1095_vm9, %v1386_v49, -inf  ;;  %v1561_v52 = vsel %vm1095_vm9, %v1555_v50, -inf }
 0x421   : > { %1418 = vmax.xlane.f32.xlu2 %v1417_v51  ;;  %1562 = vmax.xlane.f32.xlu0 %v1561_v52 }
 0x427   : > { %v1527_v54 = vpop.f32.mrf.mxu1 }
 0x428   : > { %v1558_v56 = vsel %vm1095_vm9, %v1527_v54, -inf }
 0x429   : > { %1278 = vmax.xlane.f32.xlu2 %v1277_v55  ;;  %1559 = vmax.xlane.f32.xlu0 %v1558_v56 }
 0x431   : > { %1164 = vadd.xlane.f32.xlu2 %v1163_v58 }
 0x43d   : > { %2391 = vrot.lane.b32.xlu0 %v2390_v59, %s2736_s29 }
 0x445   : > { %1580 = vrot.lane.b32.xlu0 %v3182_v14, %s2738_s4 }
 0x48c   : > { %v1276_v60 = vpop.xlane.xlu0 %1275 }
 0x48d   : > { %v1280_v61 = vsub.f32 %v1243_v45, %v1276_v60 }
 0x48f   : > { %v1282_v62 = vmul.f32 1.442695, %v1280_v61 }
 0x491   : > { %2417 = vpow2.f32 %v1282_v62 }
 0x494   : > { %v1563_v63 = vpop.xlane.xlu0 %1562  ;;  %v1419_v0 = vpop.xlane.xlu2 %1418 }
 0x495   : > { %v1565_v1 = vsub.f32 %v1555_v50, %v1563_v63  ;;  %v1423_v21 = vsub.f32 %v1386_v49, %v1419_v0 }
 0x497   : > { %v2418_v4 = vpop.eup %2417  ;;  %v1568_v5 = vmul.f32 1.442695, %v1565_v1  ;;  %v1425_v24 = vmul.f32 1.442695, %v1423_v21 }
 0x498   : > { %v1286_v6 = vsel %vm1095_vm9, %v2418_v4, 0.0 }
 0x499   : > { %2419 = vpow2.f32 %v1568_v5  ;;  %1287 = vadd.xlane.f32.xlu2 %v1286_v6  ;;  %v1647_v5 = vld [vmem:[%s3078_s30 + $0x10] sm:$0xff]  ;;  %v1646_v6 = vld [vmem:[%s3078_s30 + $0x8] sm:$0xff] }
 0x49c   : > { %v1279_v7 = vpop.xlane.xlu2 %1278  ;;  %v1560_v19 = vpop.xlane.xlu0 %1559 }
 0x49d   : > { %v1281_v9 = vsub.f32 %v1271_v39, %v1279_v7  ;;  %v1564_v28 = vsub.f32 %v1527_v54, %v1560_v19  ;;  %v1645_v7 = vld [vmem:[%s3078_s30] sm:$0xff] }
 0x49f   : > { %v3224_v10 = vpop.eup %2419  ;;  %v1284_v11 = vmul.f32 1.442695, %v1281_v9  ;;  %v1566_v32 = vmul.f32 1.442695, %v1564_v28 }
 0x4a0   : > { %v1573_v15 = vsel %vm1095_vm9, %v3224_v10, 0.0 }
 0x4a1   : > { %1574 = vadd.xlane.f32.xlu0 %v1573_v15  ;;  %2421 = vpow2.f32 %v1284_v11 }
 0x4a4   : > { %v1165_v18 = vpop.xlane.xlu2 %1164 }
 0x4a5   : > { %2423 = vrcp.f32 %v1165_v18 }
 0x4a6   : > { %2425 = vpow2.f32 %v1427_v17  ;;  %v2400_v17 = vld [vmem:[%s900_s22] ss:$0 sm:$0xff] }
 0x4a7   : > { %v2422_v20 = vpop.eup %2421  ;;  %2427 = vpow2.f32 %v1425_v24 }
 0x4a8   : > { %v1289_v22 = vsel %vm1095_vm9, %v2422_v20, 0.0  ;;  %2429 = vpow2.f32 %v1566_v32 }
 0x4a9   : > { %1290 = vadd.xlane.f32.xlu1 %v1289_v22 }
 0x4ab   : > { %v2424_v23 = vpop.eup %2423 }
 0x4ac   : > { %v1169_v25 = vmul.f32 %v2424_v23, %v2416_v57  ;;  %v2426_v26 = vpop.eup %2425 }
 0x4ad   : > { %v1432_v31 = vsel %vm1095_vm9, %v2426_v26, 0.0  ;;  %v2428_v33 = vpop.eup %2427 }
 0x4ae   : > { %2221 = vmatmul.msk.f32.vlgmr.msra.gmra.mxu0 %vm1095_vm9, %v1169_v25  ;;  %v1429_v34 = vsel %vm1095_vm9, %v2428_v33, 0.0  ;;  %v2430_v35 = vpop.eup %2429 }
 0x4af   : > { %v2392_v27 = vpop.permute.xlu0 %2391  ;;  %v1570_v36 = vsel %vm1095_vm9, %v2430_v35, 0.0 }
 0x4b0   : > { %v2394_v29 = vunpack.i.h.bf16 %v2392_v27  ;;  %v2393_v30 = vunpack.i.l.bf16 %v2392_v27 }
 0x4b1   : > { %1439 = vrot.lane.b32.xlu2 %v3182_v14, %s2737_s9  ;;  %1433 = vadd.xlane.f32.xlu1 %v1432_v31 }
 0x4b2   : > { %1318 = vmatpush.msrb.mxu3 %v2393_v30  ;;  %1345 = vmatpush.msrb.mxu0 %v2394_v29 }
 0x4b7   : > { %v1581_v40 = vpop.permute.xlu0 %1580 }
 0x4b9   : > { %1606 = vrot.lane.b32.xlu2 %v3187_v16, %s2738_s4  ;;  %1430 = vadd.xlane.f32.xlu1 %v1429_v34 }
 0x4c1   : > { %1571 = vadd.xlane.f32.xlu1 %v1570_v36  ;;  %v1691_v36 = vld [vmem:[%s3091_s25 + $0x18] sm:$0xff] }
 0x4c2   : > { %1759 = vmatpush.msrb.mxu2 %v1691_v36 }
 0x4da   : > { %1465 = vrot.lane.b32.xlu1 %v3187_v16, %s2737_s9 }
 0x50c   : > { %v1288_v14 = vpop.xlane.xlu2 %1287 }
 0x50d   : > { %2431 = vrcp.f32 %v1288_v14  ;;  %v1690_v14 = vld [vmem:[%s3091_s25 + $0x10] sm:$0xff] }
 0x50e   : > { %1760 = vmatpush.msrb.mxu2 %v1690_v14 }
 0x513   : > { %v2432_v37 = vpop.eup %2431 }
 0x514   : > { %v1440_v38 = vpop.permute.xlu2 %1439  ;;  %v1294_v39 = vmul.f32 %v2432_v37, %v2418_v4  ;;  %v1575_v51 = vpop.xlane.xlu0 %1574  ;;  %v1648_v4 = vld [vmem:[%s3078_s30 + $0x18] sm:$0xff]  ;;  %v1689_v37 = vld [vmem:[%s3091_s25 + $0x8] sm:$0xff] }
 0x515   : > { %1460 = vmatpush.msra.mxu3 %v1440_v38  ;;  %1671 = vmatpush.msra.mxu1 %v1648_v4  ;;  %v1688_v38 = vld [vmem:[%s3091_s25] sm:$0xff] }
 0x516   : > { %2226 = vmatmul.msk.f32.vlgmr.msrb.gmra.mxu3 %vm1095_vm9, %v1294_v39  ;;  %1761 = vmatpush.msrb.mxu2 %v1689_v37 }
 0x517   : > { %1601 = vmatpush.msrb.mxu3 %v1581_v40  ;;  %1672 = vmatpush.msra.mxu1 %v1647_v5 }
 0x518   : > { %1762 = vmatpush.msrb.mxu2 %v1688_v38 }
 0x519   : > { %1673 = vmatpush.msra.mxu1 %v1646_v6 }
 0x51b   : > { %1674 = vmatpush.msra.mxu1 %v1645_v7  ;;  %v1704_v7 = vld [vmem:[%s3101_s8 + $0x58] sm:$0xff] }
 0x51c   : > { %v1291_v41 = vpop.xlane.xlu1 %1290  ;;  %v1607_v55 = vpop.permute.xlu2 %1606 }
 0x51d   : > { %2433 = vrcp.f32 %v1291_v41 }
 0x523   : > { %v2434_v42 = vpop.eup %2433 }
 0x524   : > { %v1295_v43 = vmul.f32 %v2434_v42, %v2422_v20  ;;  %v1434_v44 = vpop.xlane.xlu1 %1433  ;;  %v1708_v42 = vld [vmem:[%s3101_s8 + $0x78] sm:$0xff] }
 0x525   : > { %1860 = vmatpush.msrb.mxu1 %v1708_v42 }
 0x526   : > { %2227 = vmatmul.msk.f32.vlgmr.msrb.gmra.mxu0 %vm1095_vm9, %v1295_v43  ;;  %v1707_v43 = vld [vmem:[%s3101_s8 + $0x70] sm:$0xff] }
 0x527   : > { %1861 = vmatpush.msrb.mxu1 %v1707_v43 }
 0x52b   : > { %v1213_v45 = vpop.f32.mrf.mxu0 }
 0x52c   : > { %1217 = vst.msk [vmem:[#allocation3 + $0x8] sm:$0xff] %vm1095_vm9, %v1213_v45  ;;  %v1431_v16 = vpop.xlane.xlu1 %1430 }
 0x52d   : > { %2435 = vrcp.f32 %v1431_v16 }
 0x533   : > { %v2436_v46 = vpop.eup %2435 }
 0x534   : > { %v1437_v47 = vmul.f32 %v2436_v46, %v2428_v33  ;;  %v1572_v48 = vpop.xlane.xlu1 %1571 }
 0x535   : > { %2437 = vrcp.f32 %v1572_v48  ;;  %v1705_v48 = vld [vmem:[%s3101_s8 + $0x60] sm:$0xff] }
 0x536   : > { %2232 = vmatmul.msk.f32.vlgmr.msra.gmra.mxu3 %vm1095_vm9, %v1437_v47  ;;  %2439 = vrcp.f32 %v1434_v44  ;;  %v1706_v44 = vld [vmem:[%s3101_s8 + $0x68] sm:$0xff] }
 0x537   : > { %2441 = vrcp.f32 %v1575_v51  ;;  %1776 = vmatpush.msra.mxu3 %v1708_v42  ;;  %1862 = vmatpush.msrb.mxu1 %v1706_v44 }
 0x539   : > { %1777 = vmatpush.msra.mxu3 %v1707_v43  ;;  %1863 = vmatpush.msrb.mxu1 %v1705_v48 }
 0x53b   : > { %v2438_v49 = vpop.eup %2437  ;;  %1778 = vmatpush.msra.mxu3 %v1706_v44  ;;  %1864 = vmatpush.msrb.mxu1 %v1704_v7  ;;  %v2404_v44 = vld [vmem:[%s919_s10] ss:$0 sm:$0xff] }
 0x53c   : > { %v1578_v50 = vmul.f32 %v2438_v49, %v2430_v35  ;;  %v2440_v52 = vpop.eup %2439 }
 0x53d   : > { %v1438_v53 = vmul.f32 %v2440_v52, %v2426_v26  ;;  %v2442_v56 = vpop.eup %2441  ;;  %1779 = vmatpush.msra.mxu3 %v1705_v48 }
 0x53e   : > { %2238 = vmatmul.msk.f32.vlgmr.msrb.gmra.mxu3 %vm1095_vm9, %v1578_v50  ;;  %v1579_v57 = vmul.f32 %v2442_v56, %v3224_v10 }
 0x53f   : > { %1780 = vmatpush.msra.mxu3 %v1704_v7 }
 0x54c   : > { %v1466_v54 = vpop.permute.xlu1 %1465 }
 0x54d   : > { %1486 = vmatpush.msra.mxu0 %v1466_v54  ;;  %v2401_v54 = vld [vmem:[%s755_s18] ss:$0 sm:$0xff] }
 0x54e   : > { %2233 = vmatmul.msk.f32.vlgmr.msra.gmra.mxu0 %vm1095_vm9, %v1438_v53 }
 0x54f   : > { %1627 = vmatpush.msrb.mxu0 %v1607_v55 }
 0x551   : > { %1843 = vmatpush.msra.mxu0 %v1691_v36 }
 0x553   : > { %1844 = vmatpush.msra.mxu0 %v1690_v14 }
 0x555   : > { %1845 = vmatpush.msra.mxu0 %v1689_v37 }
 0x556   : > { %2239 = vmatmul.msk.f32.vlgmr.msrb.gmra.mxu0 %vm1095_vm9, %v1579_v57 }
 0x557   : > { %1846 = vmatpush.msra.mxu0 %v1688_v38 }
 0x599   : > { %v1320_v58 = vpop.f32.mrf.mxu3 }
 0x59a   : > { %1352 = vrot.lane.b32.xlu2 %v1320_v58, %s2739_s27  ;;  %v2402_v58 = vld [vmem:[%s3500_s1] ss:$0 sm:$0xff] }
 0x5a3   : > { %v1347_v60 = vpop.f32.mrf.mxu0 }
 0x5b9   : > { %v1462_v59 = vpop.f32.mrf.mxu3 }
 0x5ba   : > { %1493 = vrot.lane.b32.xlu2 %v1462_v59, %s2740_s6 }
 0x5c1   : > { %v1603_v61 = vpop.f32.mrf.mxu3 }
 0x5c2   : > { %1354 = vrot.lane.b32.xlu2 %v1347_v60, %s2739_s27  ;;  %1634 = vrot.lane.b32.xlu1 %v1603_v61, %s2741_s11 }
 0x5cb   : > { %v1488_v62 = vpop.f32.mrf.mxu0 }
 0x5cc   : > { %1495 = vrot.lane.b32.xlu1 %v1488_v62, %s2740_s6 }
 0x5d3   : > { %v1629_v63 = vpop.f32.mrf.mxu0 }
 0x5d4   : > { %1636 = vrot.lane.b32.xlu2 %v1629_v63, %s2741_s11 }
 0x5f4   : > { %v1353_v0 = vpop.permute.xlu2 %1352 }
 0x5f5   : > { %1359 = vst.msk [vmem:[#allocation3] sm:$0xff] %vm1358_vm10, %v1353_v0 }
 0x614   : > { %v1494_v1 = vpop.permute.xlu2 %1493 }
 0x615   : > { %1500 = vst.msk [vmem:[#allocation3] sm:$0xff] %vm1499_vm11, %v1494_v1 }
 0x61c   : > { %v1355_v8 = vpop.permute.xlu2 %1354 }
 0x61d   : > { %1360 = vst.msk [vmem:[#allocation3 + $0x8] sm:$0xff] %vm1358_vm10, %v1355_v8  ;;  %v1703_v8 = vld [vmem:[%s3101_s8 + $0x50] sm:$0xff] }
 0x61e   : > { %1781 = vmatpush.msra.mxu3 %v1703_v8  ;;  %1865 = vmatpush.msrb.mxu1 %v1703_v8 }
 0x62e   : > { %v1637_v13 = vpop.permute.xlu2 %1636 }
 0x634   : > { %v1635_v9 = vpop.permute.xlu1 %1634 }
 0x635   : > { %1641 = vst.msk [vmem:[#allocation3] sm:$0xff] %vm1640_vm12, %v1635_v9  ;;  %v1702_v9 = vld [vmem:[%s3101_s8 + $0x48] sm:$0xff] }
 0x636   : > { %1782 = vmatpush.msra.mxu3 %v1702_v9  ;;  %1866 = vmatpush.msrb.mxu1 %v1702_v9 }
 0x63c   : > { %v1643_v10 = vld [vmem:[#allocation3] sm:$0xff] }
 0x63d   : > { %2240 = vmatmul.msk.f32.vlgmr.msra.gmra.mxu1 %vm934_vm1, %v1643_v10  ;;  %v1701_v10 = vld [vmem:[%s3101_s8 + $0x40] sm:$0xff] }
 0x63e   : > { %v1496_v11 = vpop.permute.xlu1 %1495  ;;  %1783 = vmatpush.msra.mxu3 %v1701_v10  ;;  %1867 = vmatpush.msrb.mxu1 %v1701_v10 }
 0x63f   : > { %1501 = vst.msk [vmem:[#allocation3 + $0x8] sm:$0xff] %vm1499_vm11, %v1496_v11  ;;  %v1700_v11 = vld [vmem:[%s3101_s8 + $0x38] sm:$0xff] }
 0x640   : > { %1642 = vst.msk [vmem:[#allocation3 + $0x8] sm:$0xff] %vm1640_vm12, %v1637_v13  ;;  %1784 = vmatpush.msra.mxu3 %v1700_v11  ;;  %1868 = vmatpush.msrb.mxu1 %v1700_v11  ;;  %v1699_v13 = vld [vmem:[%s3101_s8 + $0x30] sm:$0xff] }
 0x642   : > { %1785 = vmatpush.msra.mxu3 %v1699_v13  ;;  %1869 = vmatpush.msrb.mxu1 %v1699_v13 }
 0x647   : > { %v1644_v15 = vld [vmem:[#allocation3 + $0x8] sm:$0xff] }
 0x648   : > { %2241 = vmatmul.msk.f32.gmra.mxu1 %vm934_vm1, %v1644_v15  ;;  %v1698_v15 = vld [vmem:[%s3101_s8 + $0x28] sm:$0xff] }
 0x649   : > { %1786 = vmatpush.msra.mxu3 %v1698_v15  ;;  %1870 = vmatpush.msrb.mxu1 %v1698_v15 }
 0x6ba   : > { %v1676_v18 = vpop.f32.mrf.mxu1 }
 0x6bb   : > { %v1677_v19 = vadd.f32 %v2400_v17, %v1676_v18  ;;  %v1696_v18 = vld [vmem:[%s3101_s8 + $0x18] sm:$0xff] }
 0x6bd   : > { %v1682_v20 = vadd.f32 %v1677_v19, %v3117_v3  ;;  %v1695_v19 = vld [vmem:[%s3101_s8 + $0x10] sm:$0xff] }
 0x6bf   : > { %1684 = vst.msk [vmem:[#allocation2] sm:$0xff] %vm934_vm1, %v1682_v20  ;;  %v1694_v20 = vld [vmem:[%s3101_s8 + $0x8] sm:$0xff] }
 0x6c5   : > { %v1679_v21 = vpop.f32.mrf.mxu1 }
 0x6c6   : > { %v1680_v22 = vadd.f32 %v2400_v17, %v1679_v21  ;;  %v3264_v23 = vld [vmem:[#allocation2] sm:$0xff] }
 0x6c7   : > { %v1711_v24 = vsel %vm934_vm1, %v3264_v23, 0.0  ;;  %v1697_v17 = vld [vmem:[%s3101_s8 + $0x20] sm:$0xff] }
 0x6c8   : > { %v1683_v25 = vadd.f32 %v1680_v22, %v3115_v2  ;;  %1712 = vadd.xlane.f32.xlu0 %v1711_v24  ;;  %1787 = vmatpush.msra.mxu3 %v1697_v17  ;;  %v1693_v21 = vld [vmem:[%s3101_s8] sm:$0xff] }
 0x6c9   : > { %1871 = vmatpush.msrb.mxu1 %v1697_v17  ;;  %v2403_v22 = vld [vmem:[%s911_s3] ss:$0 sm:$0xff] }
 0x6ca   : > { %1685 = vst.msk [vmem:[#allocation2 + $0x8] sm:$0xff] %vm934_vm1, %v1683_v25  ;;  %1788 = vmatpush.msra.mxu3 %v1696_v18 }
 0x6cb   : > { %1872 = vmatpush.msrb.mxu1 %v1696_v18 }
 0x6cc   : > { %1789 = vmatpush.msra.mxu3 %v1695_v19 }
 0x6cd   : > { %1873 = vmatpush.msrb.mxu1 %v1695_v19 }
 0x6ce   : > { %1790 = vmatpush.msra.mxu3 %v1694_v20 }
 0x6cf   : > { %1874 = vmatpush.msrb.mxu1 %v1694_v20 }
 0x6d0   : > { %1791 = vmatpush.msra.mxu3 %v1693_v21 }
 0x6d1   : > { %v3270_v26 = vld [vmem:[#allocation2 + $0x8] sm:$0xff]  ;;  %1875 = vmatpush.msrb.mxu1 %v1693_v21 }
 0x6d2   : > { %v1804_v3 = vsel %vm934_vm1, %v3270_v26, 0.0 }
 0x6d3   : > { %1805 = vadd.xlane.f32.xlu1 %v1804_v3 }
 0x73b   : > { %v1713_v27 = vpop.xlane.xlu0 %1712 }
 0x73c   : > { %v1714_v28 = vmul.f32 %v1713_v27, %v3123_v12 }
 0x73e   : > { %v1715_v29 = vsub.f32 %v3264_v23, %v1714_v28 }
 0x740   : > { %v1716_v30 = vmul.f32 %v1715_v29, %v1715_v29 }
 0x742   : > { %v1717_v2 = vsel %vm934_vm1, %v1716_v30, 0.0 }
 0x743   : > { %1718 = vadd.xlane.f32.xlu2 %v1717_v2 }
 0x746   : > { %v1806_v31 = vpop.xlane.xlu1 %1805 }
 0x747   : > { %v1807_v32 = vmul.f32 %v1806_v31, %v3123_v12 }
 0x749   : > { %v3279_v33 = vsub.f32 %v3270_v26, %v1807_v32 }
 0x74b   : > { %v1809_v34 = vmul.f32 %v3279_v33, %v3279_v33 }
 0x74d   : > { %v1810_v35 = vsel %vm934_vm1, %v1809_v34, 0.0 }
 0x74e   : > { %1811 = vadd.xlane.f32.xlu0 %v1810_v35 }
 0x7b6   : > { %v1719_v39 = vpop.xlane.xlu2 %1718 }
 0x7b7   : > { %v1720_v40 = vmul.f32 %v1719_v39, %v3123_v12 }
 0x7b9   : > { %v1721_v41 = vadd.f32 1e-06, %v1720_v40 }
 0x7bb   : > { %2443 = vrsqrt.f32 %v1721_v41  ;;  %vm1728_vm14 = vweird.f32 %v1721_v41 }
 0x7c1   : > { %v2444_v45 = vpop.eup %2443  ;;  %v1812_v16 = vpop.xlane.xlu0 %1811 }
 0x7c2   : > { %v1723_v46 = vmul.f32 %v2444_v45, %v1721_v41  ;;  %v1813_v47 = vmul.f32 %v1812_v16, %v3123_v12  ;;  %vm1729_vm13 = vweird.f32 %v2444_v45 }
 0x7c3   : > { %vm1730_vm15 = vmor %vm1728_vm14, %vm1729_vm13 }
 0x7c4   : > { %v1724_v49 = vmul.f32 %v2444_v45, %v1723_v46  ;;  %v1814_v50 = vadd.f32 1e-06, %v1813_v47 }
 0x7c6   : > { %v1725_v51 = vmul.f32 0.5, %v1724_v49  ;;  %2445 = vrsqrt.f32 %v1814_v50  ;;  %vm1821_vm2 = vweird.f32 %v1814_v50 }
 0x7c8   : > { %v1726_v52 = vsub.f32 1.5, %v1725_v51 }
 0x7ca   : > { %v1727_v53 = vmul.f32 %v2444_v45, %v1726_v52 }
 0x7cc   : > { %v2446_v55 = vpop.eup %2445  ;;  %v1731_v56 = vsel %vm1730_vm15, %v2444_v45, %v1727_v53 }
 0x7cd   : > { %v1732_v12 = vmul.f32 %v1731_v56, %v1715_v29  ;;  %v1816_v57 = vmul.f32 %v2446_v55, %v1814_v50  ;;  %vm1822_vm0 = vweird.f32 %v2446_v55 }
 0x7ce   : > { %vm1823_vm3 = vmor %vm1821_vm2, %vm1822_vm0 }
 0x7cf   : > { %v1736_v59 = vmul.f32 %v2401_v54, %v1732_v12  ;;  %v1817_v60 = vmul.f32 %v2446_v55, %v1816_v57 }
 0x7d1   : > { %v1818_v61 = vmul.f32 0.5, %v1817_v60  ;;  %v1740_v62 = vadd.f32 %v2402_v58, %v1736_v59 }
 0x7d3   : > { %v1819_v63 = vsub.f32 1.5, %v1818_v61  ;;  %2242 = vmatmul.msk.f32.vlgmr.msrb.gmra.mxu2 %vm934_vm1, %v1740_v62 }
 0x7d5   : > { %v1820_v0 = vmul.f32 %v2446_v55, %v1819_v63 }
 0x7d7   : > { %v1824_v1 = vsel %vm1823_vm3, %v2446_v55, %v1820_v0 }
 0x7d8   : > { %v1825_v4 = vmul.f32 %v1824_v1, %v3279_v33 }
 0x7da   : > { %v1826_v5 = vmul.f32 %v2401_v54, %v1825_v4 }
 0x7dc   : > { %v1827_v6 = vadd.f32 %v2402_v58, %v1826_v5 }
 0x7de   : > { %2243 = vmatmul.msk.f32.vlgmr.msra.gmra.mxu0 %vm934_vm1, %v1827_v6 }
 0x856   : > { %v1764_v24 = vpop.f32.mrf.mxu2 }
 0x857   : > { %v1765_v25 = vadd.f32 %v2403_v22, %v1764_v24 }
 0x859   : > { %v1768_v3 = vmul.f32 0.044715, %v1765_v25  ;;  %v1767_v37 = vmul.f32 0.5, %v1765_v25 }
 0x85b   : > { %v1769_v27 = vmul.f32 %v1768_v3, %v1765_v25  ;;  %v1848_v28 = vpop.f32.mrf.mxu0 }
 0x85c   : > { %v1849_v29 = vadd.f32 %v2403_v22, %v1848_v28 }
 0x85d   : > { %v1770_v30 = vmul.f32 %v1769_v27, %v1765_v25 }
 0x85e   : > { %v1852_v2 = vmul.f32 0.044715, %v1849_v29  ;;  %v1851_v41 = vmul.f32 0.5, %v1849_v29 }
 0x85f   : > { %v1771_v31 = vadd.f32 %v1770_v30, %v1765_v25 }
 0x860   : > { %v1853_v32 = vmul.f32 %v1852_v2, %v1849_v29 }
 0x861   : > { %v1772_v33 = vmul.f32 0.7978846, %v1771_v31 }
 0x862   : > { %v1854_v34 = vmul.f32 %v1853_v32, %v1849_v29 }
 0x863   : > { %2447 = vtanh.f32 %v1772_v33 }
 0x864   : > { %v1855_v35 = vadd.f32 %v1854_v34, %v1849_v29 }
 0x866   : > { %v1856_v36 = vmul.f32 0.7978846, %v1855_v35 }
 0x868   : > { %2449 = vtanh.f32 %v1856_v36 }
 0x869   : > { %v2448_v14 = vpop.eup %2447 }
 0x86a   : > { %v1774_v38 = vadd.f32 1.0, %v2448_v14 }
 0x86c   : > { %v1775_v39 = vmul.f32 %v1774_v38, %v1767_v37 }
 0x86e   : > { %v2450_v40 = vpop.eup %2449  ;;  %1792 = vmatmul.f32.vlgmr.msra.gmra.mxu3 %v1775_v39 }
 0x86f   : > { %v1858_v42 = vadd.f32 1.0, %v2450_v40 }
 0x871   : > { %v1859_v43 = vmul.f32 %v1858_v42, %v1851_v41 }
 0x873   : > { %1876 = vmatmul.f32.vlgmr.msrb.gmra.mxu1 %v1859_v43 }
 0x8f0   : > { %v1877_v45 = vpop.f32.mrf.mxu1 }
 0x8f1   : > { %v1880_v16 = vadd.f32 %v1877_v45, %v3270_v26  ;;  %v1793_v46 = vpop.f32.mrf.mxu3 }
 0x8f2   : > { %v1796_v47 = vadd.f32 %v1793_v46, %v3264_v23  ;;  %1886 = sbr.rel (%p2244_p12) target bundleno = 2303 (0x8ff), region = 116 }
 0x8f3   : > { %v1881_v48 = vadd.f32 %v2404_v44, %v1880_v16 }
 0x8f4   : > { %v1800_v49 = vadd.f32 %v2404_v44, %v1796_v47 }
 0x8f5   : > { %1882 = vst.msk [vmem:[#allocation2 + $0x8] sm:$0xff] %vm934_vm1, %v1881_v48 }
 0x8f6   : > { %1801 = vst.msk [vmem:[#allocation2] sm:$0xff] %vm934_vm1, %v1800_v49 }
 0x8fc   : > { %v1888_v51 = vld [vmem:[#allocation2 + $0x8] sm:$0xff] }
 0x8fd   : > { %v1887_v50 = vld [vmem:[#allocation2] sm:$0xff]  ;;  %1890 = vst.msk [vmem:[%s3110_s28 + $0x8] sm:$0xff] %vm934_vm1, %v1888_v51 }
 0x8fe   : > { %1889 = vst.msk [vmem:[%s3110_s28] sm:$0xff] %vm934_vm1, %v1887_v50 }
 0x8ff PF: > { %s3504_s26 = sld [smem:[#allocation24_spill]]  ;;  %s1904_s15 = sshll.u32 %s3110_s28, 4  ;;  %s1905_s15 = int_to_ptr.vmem [resolvable:$true] %s1904_s15 }
 0x900   : > { %s3506_s13 = sld [smem:[#allocation52_spill]]  ;;  %s1892_s2 = scalar_lea.sflag [#allocation6], %s3020_s19 }
 0x905   : > { %s2257_s5 = sshll.u32 %s3504_s26, 4 }
 0x906   : > { %s1903_s9 = scalar_lea.hbm %s3506_s13, %s2257_s5  ;;  %s2621_s30 = scalar_lea.hbm %s3506_s13, 32 }
 0x907   : > { %s1906_s12 = sshll.u32 %s1903_s9, 4  ;;  %s1907_s12 = int_to_ptr.hbm [resolvable:$true] %s1906_s12 }
 0x908   : > { %s2615_s21 = sshra.s32 %s1907_s12, 4  ;;  %s2616_s21 = int_to_ptr.hbm [resolvable:$true] %s2615_s21 }
 0x909   : > { %s2617_s4 = scalar_lea.hbm %s2616_s21, 16  ;;  %p2622_p6 = scmp.lt.s32.totalorder %s2616_s21, %s3506_s13 }
 0x90a   : > { %p2618_p3 = scmp.ne.s32.totalorder %s2616_s21, %s2617_s4  ;;  %p2623_p10 = scmp.lt.s32.totalorder %s2621_s30, %s2617_s4 }
 0x90c   : > { %p2619_p4 = pnand %p2618_p3, %p2979_p0  ;;  %p2624_p11 = por %p2623_p10, %p2622_p6 }
 0x90e   : > { %p2620_p5 = pneg %p2619_p4 }
 0x910   : > { %p2625_p1 = pnand %p2624_p11, %p2620_p5 }
 0x912   : > { %2628 = shalt.err (!%p2625_p1)
}
 0x913   : > { %s2742_s28 = smov 128  }
 0x914   : > { %2268 = dma.vmem_to_hbm [thread:$0]  (%p2979_p0), %s1905_s15, 256, %s1907_s12, %s1892_s2, %s2742_s28, %s2742_s28, %s2739_s27  }
 0x915 PF: > { %s3507_s19 = sld [smem:[#allocation27_spill]] }
 0x916   : > { %s3508_s25 = sld [smem:[#allocation20_spill]] }
 0x91b   : > { %p2291_p2 = scmp.ge.s32.totalorder %s3507_s19, 2 }
 0x91c   : > { %s1921_s7 = sand.u32 1, %s3508_s25  }
 0x91d   : > { %p2287_p13 = pnand %p2291_p2, %p2986_p8  ;;  %s1922_s1 = scalar_lea.sflag [#allocation6], %s1921_s7 }
 0x91f   : > { %p2288_p9 = pneg %p2287_p13 }
 0x921   : > { %2686 = dma.done.wait (%p2288_p9), %s1922_s1, 256  }
 0x922   : > { %2688 = vsyncadd (%p2288_p9), %s1922_s1, 4294967040  ;;  %s39_s1 = sadd.s32 1, %s3507_s19   ;;  %s3510_s24 = sld [smem:[#allocation18_spill]] }
 0x923   : > { %p36_p7 = scmp.ge.s32.totalorder %s39_s1, 6   ;;  %s3511_s25 = sld [smem:[#allocation19_spill]] }
 0x924   : > { %s3512_s26 = sld [smem:[#allocation30_spill]] }
 0x925   : > { %s3513_s27 = sld [smem:[#allocation21_spill]] }
 0x926   : > { %s3514_s28 = sld [smem:[#allocation22_spill]] }
 0x927   : > { %s3515_s29 = sld [smem:[#allocation34_spill]]  ;;  %38 = sbr.rel (!%p36_p7) target bundleno = 32 (0x20), region = 226 }
 0x928   : > { %s3516_s0 = sld [smem:[#allocation25_spill]] }
 0x929   : > { %s3517_s30 = sld [smem:[#allocation26_spill]] }
 0x92a   : > { %s3518_s18 = sld [smem:[#allocation28_spill]] }
 0x92b   : > { %s3519_s19 = sld [smem:[#allocation31_spill]] }
 0x92c   :  { %1928 = vsyncpa [#allocation5], 1 }
 0x92d   :  { %1930 = vsyncpa [#allocation5 + $0x1], 1 }
 0x92e   :  { %1931 = vsyncpa [#allocation8], 1 }
 0x92f   :  { %1933 = vsyncpa [#allocation8 + $0x1], 1 }
 0x930   :  { %1934 = vsyncpa [#allocation11], 1 }
 0x931   :  { %1936 = vsyncpa [#allocation11 + $0x1], 1 }
 0x932   :  { %1937 = vsyncpa [#allocation6], 1 }
 0x933   :  { %1939 = vsyncpa [#allocation6 + $0x1], 1 }

</bundles_post_ra>
